<compile_context>
chip_gen: v5e
topology: v5e:2x2
jax: 0.10.0
libtpu: 0.0.40
codegen_flags: <defaults>
</compile_context>

<pallas_src>
import jax
import jax.numpy as jnp
from jax import lax
from jax.experimental import pallas as pl
from jax.experimental.pallas import tpu as pltpu

# ----------------------- synthetic small configuration -----------------------
N_CAMS = 6                 # forward() hardcodes cat of 6 camera views
C_IN = 3                   # image channels
C_IN_PAD = 8               # padded so the first dot is not degenerate
IMH = IMW = 8              # input image size (stand-in backbone keeps spatial size)
H = W = 8                  # feature-map size after backbone/neck
P = H * W                  # pixels per view (64)
NP = N_CAMS * P            # 384 pixel columns total (3 x 128 -> lane friendly)
BACKBONE_C = 16
NECK_C = 32
D = 4                      # img_view_transformer.D (depth bins)
C = 8                      # img_view_transformer.out_channels
GRID_X, GRID_Y, GRID_Z = 16, 16, 1
NUM_GRIDS = GRID_Z * GRID_Y * GRID_X   # 256 (2 x 128 -> lane friendly)
NPTS = N_CAMS * D * H * W              # 1536 lifted points
BEV_IN_C = GRID_Z * C                  # 8
BEV_BACKBONE_C = 16
BEV_NECK_C = 16
HEAD_C = 10                # synthetic pts_bbox_head output channels
HEAD_C_PAD = 16            # padded rows -> unmasked output store


# ------------------------------ fused kernel body -----------------------------
def _bevdet_fused_kernel(
    x_ref,                                      # (C_IN_PAD, NP) channel-major pixel slab
    row_ref,                                    # (1, NUM_GRIDS) int32: winner pixel column
    dbin_ref,                                   # (1, NUM_GRIDS) int32: winner depth bin
    haswin_ref,                                 # (1, NUM_GRIDS) f32: 1.0 if voxel has a winner
    bev_init_t_ref,                             # (C, NUM_GRIDS) incoming bev_feat (transposed)
    bb_wt_ref, bb_bt_ref,                       # img_backbone 1x1 conv (Cout, Cin) / (Cout, 1)
    nk_wt_ref, nk_bt_ref,                       # img_neck 1x1 conv
    dpd_wt_ref, dpd_bt_ref,                     # depth_net: depth-logit rows
    dpt_wt_ref, dpt_bt_ref,                     # depth_net: tran-feature rows
    bbb_wt_ref, bbb_bt_ref,                     # bev backbone
    bnk_wt_ref, bnk_bt_ref,                     # bev neck
    hd_wt_ref, hd_bt_ref,                       # head (padded to HEAD_C_PAD rows)
    o_ref,                                      # (HEAD_C_PAD, NUM_GRIDS) output
):
    f32 = jnp.float32

    # ---- image branch: backbone -> neck -> depth_net, all 6 cameras at once ----
    # Channel-major so the 384-pixel axis sits on lanes for every dot / ReLU.
    x = x_ref[...]
    h1 = jnp.maximum(
        jnp.dot(bb_wt_ref[...], x, preferred_element_type=f32) + bb_bt_ref[...], 0.0)
    h2 = jnp.maximum(
        jnp.dot(nk_wt_ref[...], h1, preferred_element_type=f32) + nk_bt_ref[...], 0.0)
    logits = jnp.dot(dpd_wt_ref[...], h2, preferred_element_type=f32) + dpd_bt_ref[...]  # (D, NP)
    tran_t = jnp.dot(dpt_wt_ref[...], h2, preferred_element_type=f32) + dpt_bt_ref[...]  # (C, NP)

    # ---- lift: per-pixel softmax over D depth bins (exp on EUP, approx recip) ----
    m = jnp.max(logits, axis=0, keepdims=True)
    e = jnp.exp(logits - m)
    depth_t = e * pl.reciprocal(jnp.sum(e, axis=0, keepdims=True), approx=True)          # (D, NP)

    # ---- voxel scatter as a vectorized one-hot gather on the MXU -----------------
    # Semantics: bev.index_put_((coor_1d,), feat, accumulate=False) pinned to
    # last-write-wins.  row/dbin/haswin encode the winning point per voxel
    # (precomputed in the wrapper with a trivial scatter-max); the gather
    #   bev_t[c, g] = depth_t[dbin[g], row[g]] * tran_t[c, row[g]]
    # is realized as  [tran_t; depth_t] @ onehot(row)  plus a depth-bin select,
    # so the 1536-point lift never materializes and nothing is serialized.
    r_onehot = (lax.broadcasted_iota(jnp.int32, (NP, NUM_GRIDS), 0)
                == row_ref[...]).astype(f32)                                             # (NP, G)
    g_tran = jnp.dot(tran_t, r_onehot, preferred_element_type=f32)                       # (C, G)
    g_depth = jnp.dot(depth_t, r_onehot, preferred_element_type=f32)                     # (D, G)
    d_onehot = (lax.broadcasted_iota(jnp.int32, (D, NUM_GRIDS), 0)
                == dbin_ref[...]).astype(f32)                                            # (D, G)
    scale = jnp.sum(g_depth * d_onehot, axis=0, keepdims=True)                           # (1, G)
    hw = haswin_ref[...]
    bev_t = hw * (scale * g_tran) + (1.0 - hw) * bev_init_t_ref[...]                     # (C, G)

    # ---- BEV encoder backbone / neck / head (256-wide spatial axis on lanes) ----
    g1 = jnp.maximum(
        jnp.dot(bbb_wt_ref[...], bev_t, preferred_element_type=f32) + bbb_bt_ref[...], 0.0)
    g2 = jnp.maximum(
        jnp.dot(bnk_wt_ref[...], g1, preferred_element_type=f32) + bnk_bt_ref[...], 0.0)
    o_ref[...] = jnp.dot(hd_wt_ref[...], g2, preferred_element_type=f32) + hd_bt_ref[...]


# --------------------------------- parameters ---------------------------------
def init_params(key):
    ks = jax.random.split(key, 14)

    def mk_wT(k, cin, cout):   # stored transposed: (Cout, Cin)
        return jax.random.normal(k, (cout, cin), jnp.float32) / jnp.sqrt(float(cin))

    def mk_bT(k, cout):
        return jax.random.normal(k, (cout, 1), jnp.float32) * 0.01

    backbone_wT = jnp.pad(mk_wT(ks[0], C_IN, BACKBONE_C),
                          ((0, 0), (0, C_IN_PAD - C_IN)))          # zero cols for padded inputs
    head_wT = jnp.pad(mk_wT(ks[12], BEV_NECK_C, HEAD_C),
                      ((0, HEAD_C_PAD - HEAD_C), (0, 0)))          # zero rows -> unmasked store
    head_bT = jnp.pad(mk_bT(ks[13], HEAD_C),
                      ((0, HEAD_C_PAD - HEAD_C), (0, 0)))

    return {
        "backbone_wT": backbone_wT, "backbone_bT": mk_bT(ks[1], BACKBONE_C),
        "neck_wT": mk_wT(ks[2], BACKBONE_C, NECK_C), "neck_bT": mk_bT(ks[3], NECK_C),
        "depth_d_wT": mk_wT(ks[4], NECK_C, D), "depth_d_bT": mk_bT(ks[5], D),
        "depth_t_wT": mk_wT(ks[6], NECK_C, C), "depth_t_bT": mk_bT(ks[7], C),
        "bev_backbone_wT": mk_wT(ks[8], BEV_IN_C, BEV_BACKBONE_C),
        "bev_backbone_bT": mk_bT(ks[9], BEV_BACKBONE_C),
        "bev_neck_wT": mk_wT(ks[10], BEV_BACKBONE_C, BEV_NECK_C),
        "bev_neck_bT": mk_bT(ks[11], BEV_NECK_C),
        "head_wT": head_wT, "head_bT": head_bT,
    }


# ------------------------------- forward (B = 1) -------------------------------
def bevdet_forward(imgs, bev_feat, lidar_coor_1d, params):
    """imgs: (N, 1, C_IN, IMH, IMW); bev_feat: (NUM_GRIDS+1, C);
    lidar_coor_1d: (NPTS,) int32 in [0, NUM_GRIDS] -> (1, HEAD_C, Y, X)."""
    # Single layout op per tensor at the module boundary.
    x_t = imgs[:, 0].transpose(1, 0, 2, 3).reshape(C_IN, NP)       # column = n*P + h*W + w
    x_t = jnp.pad(x_t, ((0, C_IN_PAD - C_IN), (0, 0)))
    bev_init_t = bev_feat[:NUM_GRIDS, :].T                          # (C, G) lane-dense

    # Last-write-wins winner per voxel: the only data-dependent part of
    # index_put_ (trivial XLA scatter-max over 1536 ints, per review option (b));
    # all heavy work stays inside the fused kernel.
    pt_ids = jnp.arange(NPTS, dtype=jnp.int32)
    winner = jnp.full((NUM_GRIDS + 1,), -1, jnp.int32).at[lidar_coor_1d].max(pt_ids)
    winner = winner[:NUM_GRIDS]                                     # dummy/out-of-range row dropped
    has_winner = winner >= 0
    wsafe = jnp.maximum(winner, 0)                                  # point id = (n*D + d)*P + p
    cam = wsafe // (D * P)
    dbin = (wsafe // P) % D
    pix = wsafe % P
    row = cam * P + pix                                             # pixel column n*P + p

    row2 = row.reshape(1, NUM_GRIDS).astype(jnp.int32)
    dbin2 = dbin.reshape(1, NUM_GRIDS).astype(jnp.int32)
    hw2 = has_winner.reshape(1, NUM_GRIDS).astype(jnp.float32)

    operands = (
        x_t, row2, dbin2, hw2, bev_init_t,
        params["backbone_wT"], params["backbone_bT"],
        params["neck_wT"], params["neck_bT"],
        params["depth_d_wT"], params["depth_d_bT"],
        params["depth_t_wT"], params["depth_t_bT"],
        params["bev_backbone_wT"], params["bev_backbone_bT"],
        params["bev_neck_wT"], params["bev_neck_bT"],
        params["head_wT"], params["head_bT"],
    )

    def whole(a):
        return pl.BlockSpec(a.shape, lambda i, _nd=a.ndim: (0,) * _nd)

    flops = 2 * (NP * (C_IN_PAD * BACKBONE_C + BACKBONE_C * NECK_C + NECK_C * (D + C))
                 + NP * NUM_GRIDS * (D + C)
                 + NUM_GRIDS * (BEV_IN_C * BEV_BACKBONE_C
                                + BEV_BACKBONE_C * BEV_NECK_C
                                + BEV_NECK_C * HEAD_C_PAD))
    bytes_accessed = 4 * (sum(int(a.size) for a in operands) + HEAD_C_PAD * NUM_GRIDS)

    out2d = pl.pallas_call(
        _bevdet_fused_kernel,
        grid=(1,),
        in_specs=[whole(a) for a in operands],
        out_specs=pl.BlockSpec((HEAD_C_PAD, NUM_GRIDS), lambda i: (0, 0)),
        out_shape=jax.ShapeDtypeStruct((HEAD_C_PAD, NUM_GRIDS), jnp.float32),
        compiler_params=pltpu.CompilerParams(dimension_semantics=("arbitrary",)),
        cost_estimate=pl.CostEstimate(
            flops=flops, transcendentals=NP * (D + 1), bytes_accessed=bytes_accessed),
    )(*operands)

    # (HEAD_C_PAD, Y*X) is channel-major -> slice pad rows, reshape to NCHW.
    return out2d[:HEAD_C].reshape(HEAD_C, GRID_Y, GRID_X)[None]


# ---------------------- pure-JAX reference (for self-check) --------------------
def bevdet_forward_ref(imgs, bev_feat, lidar_coor_1d, params):
    hp = lax.Precision.HIGHEST
    relu = jax.nn.relu
    x_t = imgs[:, 0].transpose(1, 0, 2, 3).reshape(C_IN, NP)
    x_t = jnp.pad(x_t, ((0, C_IN_PAD - C_IN), (0, 0)))
    h1 = relu(jnp.dot(params["backbone_wT"], x_t, precision=hp) + params["backbone_bT"])
    h2 = relu(jnp.dot(params["neck_wT"], h1, precision=hp) + params["neck_bT"])
    logits = jnp.dot(params["depth_d_wT"], h2, precision=hp) + params["depth_d_bT"]
    tran_t = jnp.dot(params["depth_t_wT"], h2, precision=hp) + params["depth_t_bT"]
    depth_t = jax.nn.softmax(logits, axis=0)                        # (D, NP)

    # feat[(n*D + d)*P + p, c] = depth_t[d, n*P + p] * tran_t[c, n*P + p]
    depth_r = depth_t.reshape(D, N_CAMS, P).transpose(1, 0, 2)      # (N, D, P)
    tran_r = tran_t.reshape(C, N_CAMS, P).transpose(1, 0, 2)        # (N, C, P)
    feat = (depth_r[:, :, None, :] * tran_r[:, None, :, :])         # (N, D, C, P)
    feat = feat.transpose(0, 1, 3, 2).reshape(NPTS, C)

    # last-write-wins scatter (same semantic pin as the kernel)
    winner = jnp.full((NUM_GRIDS + 1,), -1, jnp.int32).at[lidar_coor_1d].max(
        jnp.arange(NPTS, dtype=jnp.int32))[:NUM_GRIDS]
    bev = jnp.where((winner >= 0)[:, None],
                    feat[jnp.maximum(winner, 0), :],
                    bev_feat[:NUM_GRIDS, :])                        # (G, C)
    bev_t = bev.T
    g1 = relu(jnp.dot(params["bev_backbone_wT"], bev_t, precision=hp)
              + params["bev_backbone_bT"])
    g2 = relu(jnp.dot(params["bev_neck_wT"], g1, precision=hp) + params["bev_neck_bT"])
    out = jnp.dot(params["head_wT"], g2, precision=hp) + params["head_bT"]
    return out[:HEAD_C].reshape(HEAD_C, GRID_Y, GRID_X)[None]


# ------------------------------------ main ------------------------------------
if __name__ == "__main__":
    key = jax.random.PRNGKey(0)
    k_params, k_imgs, k_coor = jax.random.split(key, 3)

    params = init_params(k_params)
    imgs = jax.random.normal(k_imgs, (N_CAMS, 1, C_IN, IMH, IMW), jnp.float32)
    # out-of-range voxels are mapped to the dummy row NUM_GRIDS (dropped later)
    lidar_coor_1d = jax.random.randint(
        k_coor, (NPTS,), 0, NUM_GRIDS + 1, dtype=jnp.int32)
    bev_feat = jnp.zeros((NUM_GRIDS + 1, C), jnp.float32)

    out = jax.jit(bevdet_forward)(imgs, bev_feat, lidar_coor_1d, params)
    jax.block_until_ready(out)
    assert out.shape == (1, HEAD_C, GRID_Y, GRID_X)

    ref = bevdet_forward_ref(imgs, bev_feat, lidar_coor_1d, params)
    assert jnp.allclose(out, ref, rtol=5e-2, atol=5e-2), float(jnp.max(jnp.abs(out - ref)))
    print("KERNEL_OK")
</pallas_src>

<mosaic_0001>
module attributes {stable_mosaic.version = 11 : i64} {
  func.func @_bevdet_fused_kernel(%arg0: i32, %arg1: memref<8x384xf32, #tpu.memory_space<vmem>>, %arg2: memref<1x256xi32, #tpu.memory_space<vmem>>, %arg3: memref<1x256xi32, #tpu.memory_space<vmem>>, %arg4: memref<1x256xf32, #tpu.memory_space<vmem>>, %arg5: memref<8x256xf32, #tpu.memory_space<vmem>>, %arg6: memref<16x8xf32, #tpu.memory_space<vmem>>, %arg7: memref<16x1xf32, #tpu.memory_space<vmem>>, %arg8: memref<32x16xf32, #tpu.memory_space<vmem>>, %arg9: memref<32x1xf32, #tpu.memory_space<vmem>>, %arg10: memref<4x32xf32, #tpu.memory_space<vmem>>, %arg11: memref<4x1xf32, #tpu.memory_space<vmem>>, %arg12: memref<8x32xf32, #tpu.memory_space<vmem>>, %arg13: memref<8x1xf32, #tpu.memory_space<vmem>>, %arg14: memref<16x8xf32, #tpu.memory_space<vmem>>, %arg15: memref<16x1xf32, #tpu.memory_space<vmem>>, %arg16: memref<16x16xf32, #tpu.memory_space<vmem>>, %arg17: memref<16x1xf32, #tpu.memory_space<vmem>>, %arg18: memref<16x16xf32, #tpu.memory_space<vmem>>, %arg19: memref<16x1xf32, #tpu.memory_space<vmem>>, %arg20: memref<16x256xf32, #tpu.memory_space<vmem>>) attributes {dimension_semantics = [#tpu.dimension_semantics<arbitrary>], iteration_bounds = array<i64: 1>, scalar_prefetch = 0 : i64, scratch_operands = 0 : i64, tpu.core_type = #tpu.core_type<tc>, window_params = [{pipeline_mode = #tpu.pipeline_mode<synchronous>, transform_indices = @transform_0, window_bounds = array<i64: 8, 384>}, {pipeline_mode = #tpu.pipeline_mode<synchronous>, transform_indices = @transform_1, window_bounds = array<i64: 1, 256>}, {pipeline_mode = #tpu.pipeline_mode<synchronous>, transform_indices = @transform_2, window_bounds = array<i64: 1, 256>}, {pipeline_mode = #tpu.pipeline_mode<synchronous>, transform_indices = @transform_3, window_bounds = array<i64: 1, 256>}, {pipeline_mode = #tpu.pipeline_mode<synchronous>, transform_indices = @transform_4, window_bounds = array<i64: 8, 256>}, {pipeline_mode = #tpu.pipeline_mode<synchronous>, transform_indices = @transform_5, window_bounds = array<i64: 16, 8>}, {pipeline_mode = #tpu.pipeline_mode<synchronous>, transform_indices = @transform_6, window_bounds = array<i64: 16, 1>}, {pipeline_mode = #tpu.pipeline_mode<synchronous>, transform_indices = @transform_7, window_bounds = array<i64: 32, 16>}, {pipeline_mode = #tpu.pipeline_mode<synchronous>, transform_indices = @transform_8, window_bounds = array<i64: 32, 1>}, {pipeline_mode = #tpu.pipeline_mode<synchronous>, transform_indices = @transform_9, window_bounds = array<i64: 4, 32>}, {pipeline_mode = #tpu.pipeline_mode<synchronous>, transform_indices = @transform_10, window_bounds = array<i64: 4, 1>}, {pipeline_mode = #tpu.pipeline_mode<synchronous>, transform_indices = @transform_11, window_bounds = array<i64: 8, 32>}, {pipeline_mode = #tpu.pipeline_mode<synchronous>, transform_indices = @transform_12, window_bounds = array<i64: 8, 1>}, {pipeline_mode = #tpu.pipeline_mode<synchronous>, transform_indices = @transform_13, window_bounds = array<i64: 16, 8>}, {pipeline_mode = #tpu.pipeline_mode<synchronous>, transform_indices = @transform_14, window_bounds = array<i64: 16, 1>}, {pipeline_mode = #tpu.pipeline_mode<synchronous>, transform_indices = @transform_15, window_bounds = array<i64: 16, 16>}, {pipeline_mode = #tpu.pipeline_mode<synchronous>, transform_indices = @transform_16, window_bounds = array<i64: 16, 1>}, {pipeline_mode = #tpu.pipeline_mode<synchronous>, transform_indices = @transform_17, window_bounds = array<i64: 16, 16>}, {pipeline_mode = #tpu.pipeline_mode<synchronous>, transform_indices = @transform_18, window_bounds = array<i64: 16, 1>}, {pipeline_mode = #tpu.pipeline_mode<synchronous>, transform_indices = @transform_19, window_bounds = array<i64: 16, 256>}]} {
    %c0 = arith.constant 0 : index
    %c0_0 = arith.constant 0 : index
    %0 = vector.load %arg1[%c0, %c0_0] : memref<8x384xf32, #tpu.memory_space<vmem>>, vector<8x384xf32>
    %c0_1 = arith.constant 0 : index
    %c0_2 = arith.constant 0 : index
    %1 = vector.load %arg6[%c0_1, %c0_2] : memref<16x8xf32, #tpu.memory_space<vmem>>, vector<16x8xf32>
    %cst = arith.constant dense<0.000000e+00> : vector<16x384xf32>
    %2 = tpu.matmul %1, %0, %cst {dimension_numbers = #tpu.dot_dimension_numbers<[1], [0], [0], [1], [0, 0, 1, 1], [], []>} : vector<16x8xf32>, vector<8x384xf32>, vector<16x384xf32> -> vector<16x384xf32>
    %c0_3 = arith.constant 0 : index
    %c0_4 = arith.constant 0 : index
    %3 = vector.load %arg7[%c0_3, %c0_4] : memref<16x1xf32, #tpu.memory_space<vmem>>, vector<16x1xf32>
    %4 = vector.broadcast %3 : vector<16x1xf32> to vector<16x384xf32>
    %5 = arith.addf %2, %4 : vector<16x384xf32>
    %cst_5 = arith.constant 0.000000e+00 : f32
    %6 = vector.broadcast %cst_5 : f32 to vector<16x384xf32>
    %7 = arith.maximumf %5, %6 : vector<16x384xf32>
    %c0_6 = arith.constant 0 : index
    %c0_7 = arith.constant 0 : index
    %8 = vector.load %arg8[%c0_6, %c0_7] : memref<32x16xf32, #tpu.memory_space<vmem>>, vector<32x16xf32>
    %cst_8 = arith.constant dense<0.000000e+00> : vector<32x384xf32>
    %9 = tpu.matmul %8, %7, %cst_8 {dimension_numbers = #tpu.dot_dimension_numbers<[1], [0], [0], [1], [0, 0, 1, 1], [], []>} : vector<32x16xf32>, vector<16x384xf32>, vector<32x384xf32> -> vector<32x384xf32>
    %c0_9 = arith.constant 0 : index
    %c0_10 = arith.constant 0 : index
    %10 = vector.load %arg9[%c0_9, %c0_10] : memref<32x1xf32, #tpu.memory_space<vmem>>, vector<32x1xf32>
    %11 = vector.broadcast %10 : vector<32x1xf32> to vector<32x384xf32>
    %12 = arith.addf %9, %11 : vector<32x384xf32>
    %cst_11 = arith.constant 0.000000e+00 : f32
    %13 = vector.broadcast %cst_11 : f32 to vector<32x384xf32>
    %14 = arith.maximumf %12, %13 : vector<32x384xf32>
    %c0_12 = arith.constant 0 : index
    %c0_13 = arith.constant 0 : index
    %15 = vector.load %arg10[%c0_12, %c0_13] : memref<4x32xf32, #tpu.memory_space<vmem>>, vector<4x32xf32>
    %cst_14 = arith.constant dense<0.000000e+00> : vector<4x384xf32>
    %16 = tpu.matmul %15, %14, %cst_14 {dimension_numbers = #tpu.dot_dimension_numbers<[1], [0], [0], [1], [0, 0, 1, 1], [], []>} : vector<4x32xf32>, vector<32x384xf32>, vector<4x384xf32> -> vector<4x384xf32>
    %c0_15 = arith.constant 0 : index
    %c0_16 = arith.constant 0 : index
    %17 = vector.load %arg11[%c0_15, %c0_16] : memref<4x1xf32, #tpu.memory_space<vmem>>, vector<4x1xf32>
    %18 = vector.broadcast %17 : vector<4x1xf32> to vector<4x384xf32>
    %19 = arith.addf %16, %18 : vector<4x384xf32>
    %c0_17 = arith.constant 0 : index
    %c0_18 = arith.constant 0 : index
    %20 = vector.load %arg12[%c0_17, %c0_18] : memref<8x32xf32, #tpu.memory_space<vmem>>, vector<8x32xf32>
    %cst_19 = arith.constant dense<0.000000e+00> : vector<8x384xf32>
    %21 = tpu.matmul %20, %14, %cst_19 {dimension_numbers = #tpu.dot_dimension_numbers<[1], [0], [0], [1], [0, 0, 1, 1], [], []>} : vector<8x32xf32>, vector<32x384xf32>, vector<8x384xf32> -> vector<8x384xf32>
    %c0_20 = arith.constant 0 : index
    %c0_21 = arith.constant 0 : index
    %22 = vector.load %arg13[%c0_20, %c0_21] : memref<8x1xf32, #tpu.memory_space<vmem>>, vector<8x1xf32>
    %23 = vector.broadcast %22 : vector<8x1xf32> to vector<8x384xf32>
    %24 = arith.addf %21, %23 : vector<8x384xf32>
    %cst_22 = arith.constant dense<0xFF800000> : vector<384xf32>
    %25 = vector.multi_reduction <maximumf>, %19, %cst_22 [0] : vector<4x384xf32> to vector<384xf32>
    %26 = vector.shape_cast %25 : vector<384xf32> to vector<1x384xf32>
    %27 = vector.broadcast %26 : vector<1x384xf32> to vector<4x384xf32>
    %28 = arith.subf %19, %27 : vector<4x384xf32>
    %29 = math.exp %28 : vector<4x384xf32>
    %cst_23 = arith.constant dense<0.000000e+00> : vector<384xf32>
    %30 = vector.multi_reduction <add>, %29, %cst_23 [0] : vector<4x384xf32> to vector<384xf32>
    %31 = vector.shape_cast %30 : vector<384xf32> to vector<1x384xf32>
    %32 = tpu.reciprocal %31 {approx = true} : vector<1x384xf32> -> vector<1x384xf32>
    %33 = vector.broadcast %32 : vector<1x384xf32> to vector<4x384xf32>
    %34 = arith.mulf %29, %33 : vector<4x384xf32>
    %35 = tpu.iota {dimensions = array<i32: 0>} : vector<384x256xi32>
    %c0_24 = arith.constant 0 : index
    %c0_25 = arith.constant 0 : index
    %36 = vector.load %arg2[%c0_24, %c0_25] : memref<1x256xi32, #tpu.memory_space<vmem>>, vector<1x256xi32>
    %37 = vector.broadcast %36 : vector<1x256xi32> to vector<384x256xi32>
    %38 = arith.cmpi eq, %35, %37 : vector<384x256xi32>
    %39 = arith.extui %38 : vector<384x256xi1> to vector<384x256xi32>
    %40 = arith.sitofp %39 : vector<384x256xi32> to vector<384x256xf32>
    %cst_26 = arith.constant dense<0.000000e+00> : vector<8x256xf32>
    %41 = tpu.matmul %24, %40, %cst_26 {dimension_numbers = #tpu.dot_dimension_numbers<[1], [0], [0], [1], [0, 0, 1, 1], [], []>} : vector<8x384xf32>, vector<384x256xf32>, vector<8x256xf32> -> vector<8x256xf32>
    %cst_27 = arith.constant dense<0.000000e+00> : vector<4x256xf32>
    %42 = tpu.matmul %34, %40, %cst_27 {dimension_numbers = #tpu.dot_dimension_numbers<[1], [0], [0], [1], [0, 0, 1, 1], [], []>} : vector<4x384xf32>, vector<384x256xf32>, vector<4x256xf32> -> vector<4x256xf32>
    %43 = tpu.iota {dimensions = array<i32: 0>} : vector<4x256xi32>
    %c0_28 = arith.constant 0 : index
    %c0_29 = arith.constant 0 : index
    %44 = vector.load %arg3[%c0_28, %c0_29] : memref<1x256xi32, #tpu.memory_space<vmem>>, vector<1x256xi32>
    %45 = vector.broadcast %44 : vector<1x256xi32> to vector<4x256xi32>
    %46 = arith.cmpi eq, %43, %45 : vector<4x256xi32>
    %47 = arith.extui %46 : vector<4x256xi1> to vector<4x256xi32>
    %48 = arith.sitofp %47 : vector<4x256xi32> to vector<4x256xf32>
    %49 = arith.mulf %42, %48 : vector<4x256xf32>
    %cst_30 = arith.constant dense<0.000000e+00> : vector<256xf32>
    %50 = vector.multi_reduction <add>, %49, %cst_30 [0] : vector<4x256xf32> to vector<256xf32>
    %51 = vector.shape_cast %50 : vector<256xf32> to vector<1x256xf32>
    %c0_31 = arith.constant 0 : index
    %c0_32 = arith.constant 0 : index
    %52 = vector.load %arg4[%c0_31, %c0_32] : memref<1x256xf32, #tpu.memory_space<vmem>>, vector<1x256xf32>
    %53 = vector.broadcast %51 : vector<1x256xf32> to vector<8x256xf32>
    %54 = arith.mulf %53, %41 : vector<8x256xf32>
    %55 = vector.broadcast %52 : vector<1x256xf32> to vector<8x256xf32>
    %56 = arith.mulf %55, %54 : vector<8x256xf32>
    %cst_33 = arith.constant 1.000000e+00 : f32
    %57 = vector.broadcast %cst_33 : f32 to vector<1x256xf32>
    %58 = arith.subf %57, %52 : vector<1x256xf32>
    %c0_34 = arith.constant 0 : index
    %c0_35 = arith.constant 0 : index
    %59 = vector.load %arg5[%c0_34, %c0_35] : memref<8x256xf32, #tpu.memory_space<vmem>>, vector<8x256xf32>
    %60 = vector.broadcast %58 : vector<1x256xf32> to vector<8x256xf32>
    %61 = arith.mulf %60, %59 : vector<8x256xf32>
    %62 = arith.addf %56, %61 : vector<8x256xf32>
    %c0_36 = arith.constant 0 : index
    %c0_37 = arith.constant 0 : index
    %63 = vector.load %arg14[%c0_36, %c0_37] : memref<16x8xf32, #tpu.memory_space<vmem>>, vector<16x8xf32>
    %cst_38 = arith.constant dense<0.000000e+00> : vector<16x256xf32>
    %64 = tpu.matmul %63, %62, %cst_38 {dimension_numbers = #tpu.dot_dimension_numbers<[1], [0], [0], [1], [0, 0, 1, 1], [], []>} : vector<16x8xf32>, vector<8x256xf32>, vector<16x256xf32> -> vector<16x256xf32>
    %c0_39 = arith.constant 0 : index
    %c0_40 = arith.constant 0 : index
    %65 = vector.load %arg15[%c0_39, %c0_40] : memref<16x1xf32, #tpu.memory_space<vmem>>, vector<16x1xf32>
    %66 = vector.broadcast %65 : vector<16x1xf32> to vector<16x256xf32>
    %67 = arith.addf %64, %66 : vector<16x256xf32>
    %cst_41 = arith.constant 0.000000e+00 : f32
    %68 = vector.broadcast %cst_41 : f32 to vector<16x256xf32>
    %69 = arith.maximumf %67, %68 : vector<16x256xf32>
    %c0_42 = arith.constant 0 : index
    %c0_43 = arith.constant 0 : index
    %70 = vector.load %arg16[%c0_42, %c0_43] : memref<16x16xf32, #tpu.memory_space<vmem>>, vector<16x16xf32>
    %cst_44 = arith.constant dense<0.000000e+00> : vector<16x256xf32>
    %71 = tpu.matmul %70, %69, %cst_44 {dimension_numbers = #tpu.dot_dimension_numbers<[1], [0], [0], [1], [0, 0, 1, 1], [], []>} : vector<16x16xf32>, vector<16x256xf32>, vector<16x256xf32> -> vector<16x256xf32>
    %c0_45 = arith.constant 0 : index
    %c0_46 = arith.constant 0 : index
    %72 = vector.load %arg17[%c0_45, %c0_46] : memref<16x1xf32, #tpu.memory_space<vmem>>, vector<16x1xf32>
    %73 = vector.broadcast %72 : vector<16x1xf32> to vector<16x256xf32>
    %74 = arith.addf %71, %73 : vector<16x256xf32>
    %cst_47 = arith.constant 0.000000e+00 : f32
    %75 = vector.broadcast %cst_47 : f32 to vector<16x256xf32>
    %76 = arith.maximumf %74, %75 : vector<16x256xf32>
    %c0_48 = arith.constant 0 : index
    %c0_49 = arith.constant 0 : index
    %77 = vector.load %arg18[%c0_48, %c0_49] : memref<16x16xf32, #tpu.memory_space<vmem>>, vector<16x16xf32>
    %cst_50 = arith.constant dense<0.000000e+00> : vector<16x256xf32>
    %78 = tpu.matmul %77, %76, %cst_50 {dimension_numbers = #tpu.dot_dimension_numbers<[1], [0], [0], [1], [0, 0, 1, 1], [], []>} : vector<16x16xf32>, vector<16x256xf32>, vector<16x256xf32> -> vector<16x256xf32>
    %c0_51 = arith.constant 0 : index
    %c0_52 = arith.constant 0 : index
    %79 = vector.load %arg19[%c0_51, %c0_52] : memref<16x1xf32, #tpu.memory_space<vmem>>, vector<16x1xf32>
    %80 = vector.broadcast %79 : vector<16x1xf32> to vector<16x256xf32>
    %81 = arith.addf %78, %80 : vector<16x256xf32>
    %c0_53 = arith.constant 0 : index
    %c0_54 = arith.constant 0 : index
    %82 = vector.load %arg20[%c0_53, %c0_54] : memref<16x256xf32, #tpu.memory_space<vmem>>, vector<16x256xf32>
    tpu.vector_store %arg20[%c0_53, %c0_54], %81 {strides = array<i32>} : memref<16x256xf32, #tpu.memory_space<vmem>>, vector<16x256xf32>,
    return
  }
  func.func @transform_0(%arg0: i32) -> (i32, i32) {
    %c0_i32 = arith.constant 0 : i32
    %c0_i32_0 = arith.constant 0 : i32
    %c0_i32_1 = arith.constant 0 : i32
    return %c0_i32, %c0_i32_0 : i32, i32
  }
  func.func @transform_1(%arg0: i32) -> (i32, i32) {
    %c0_i32 = arith.constant 0 : i32
    %c0_i32_0 = arith.constant 0 : i32
    %c0_i32_1 = arith.constant 0 : i32
    return %c0_i32, %c0_i32_0 : i32, i32
  }
  func.func @transform_2(%arg0: i32) -> (i32, i32) {
    %c0_i32 = arith.constant 0 : i32
    %c0_i32_0 = arith.constant 0 : i32
    %c0_i32_1 = arith.constant 0 : i32
    return %c0_i32, %c0_i32_0 : i32, i32
  }
  func.func @transform_3(%arg0: i32) -> (i32, i32) {
    %c0_i32 = arith.constant 0 : i32
    %c0_i32_0 = arith.constant 0 : i32
    %c0_i32_1 = arith.constant 0 : i32
    return %c0_i32, %c0_i32_0 : i32, i32
  }
  func.func @transform_4(%arg0: i32) -> (i32, i32) {
    %c0_i32 = arith.constant 0 : i32
    %c0_i32_0 = arith.constant 0 : i32
    %c0_i32_1 = arith.constant 0 : i32
    return %c0_i32, %c0_i32_0 : i32, i32
  }
  func.func @transform_5(%arg0: i32) -> (i32, i32) {
    %c0_i32 = arith.constant 0 : i32
    %c0_i32_0 = arith.constant 0 : i32
    %c0_i32_1 = arith.constant 0 : i32
    return %c0_i32, %c0_i32_0 : i32, i32
  }
  func.func @transform_6(%arg0: i32) -> (i32, i32) {
    %c0_i32 = arith.constant 0 : i32
    %c0_i32_0 = arith.constant 0 : i32
    %c0_i32_1 = arith.constant 0 : i32
    return %c0_i32, %c0_i32_0 : i32, i32
  }
  func.func @transform_7(%arg0: i32) -> (i32, i32) {
    %c0_i32 = arith.constant 0 : i32
    %c0_i32_0 = arith.constant 0 : i32
    %c0_i32_1 = arith.constant 0 : i32
    return %c0_i32, %c0_i32_0 : i32, i32
  }
  func.func @transform_8(%arg0: i32) -> (i32, i32) {
    %c0_i32 = arith.constant 0 : i32
    %c0_i32_0 = arith.constant 0 : i32
    %c0_i32_1 = arith.constant 0 : i32
    return %c0_i32, %c0_i32_0 : i32, i32
  }
  func.func @transform_9(%arg0: i32) -> (i32, i32) {
    %c0_i32 = arith.constant 0 : i32
    %c0_i32_0 = arith.constant 0 : i32
    %c0_i32_1 = arith.constant 0 : i32
    return %c0_i32, %c0_i32_0 : i32, i32
  }
  func.func @transform_10(%arg0: i32) -> (i32, i32) {
    %c0_i32 = arith.constant 0 : i32
    %c0_i32_0 = arith.constant 0 : i32
    %c0_i32_1 = arith.constant 0 : i32
    return %c0_i32, %c0_i32_0 : i32, i32
  }
  func.func @transform_11(%arg0: i32) -> (i32, i32) {
    %c0_i32 = arith.constant 0 : i32
    %c0_i32_0 = arith.constant 0 : i32
    %c0_i32_1 = arith.constant 0 : i32
    return %c0_i32, %c0_i32_0 : i32, i32
  }
  func.func @transform_12(%arg0: i32) -> (i32, i32) {
    %c0_i32 = arith.constant 0 : i32
    %c0_i32_0 = arith.constant 0 : i32
    %c0_i32_1 = arith.constant 0 : i32
    return %c0_i32, %c0_i32_0 : i32, i32
  }
  func.func @transform_13(%arg0: i32) -> (i32, i32) {
    %c0_i32 = arith.constant 0 : i32
    %c0_i32_0 = arith.constant 0 : i32
    %c0_i32_1 = arith.constant 0 : i32
    return %c0_i32, %c0_i32_0 : i32, i32
  }
  func.func @transform_14(%arg0: i32) -> (i32, i32) {
    %c0_i32 = arith.constant 0 : i32
    %c0_i32_0 = arith.constant 0 : i32
    %c0_i32_1 = arith.constant 0 : i32
    return %c0_i32, %c0_i32_0 : i32, i32
  }
  func.func @transform_15(%arg0: i32) -> (i32, i32) {
    %c0_i32 = arith.constant 0 : i32
    %c0_i32_0 = arith.constant 0 : i32
    %c0_i32_1 = arith.constant 0 : i32
    return %c0_i32, %c0_i32_0 : i32, i32
  }
  func.func @transform_16(%arg0: i32) -> (i32, i32) {
    %c0_i32 = arith.constant 0 : i32
    %c0_i32_0 = arith.constant 0 : i32
    %c0_i32_1 = arith.constant 0 : i32
    return %c0_i32, %c0_i32_0 : i32, i32
  }
  func.func @transform_17(%arg0: i32) -> (i32, i32) {
    %c0_i32 = arith.constant 0 : i32
    %c0_i32_0 = arith.constant 0 : i32
    %c0_i32_1 = arith.constant 0 : i32
    return %c0_i32, %c0_i32_0 : i32, i32
  }
  func.func @transform_18(%arg0: i32) -> (i32, i32) {
    %c0_i32 = arith.constant 0 : i32
    %c0_i32_0 = arith.constant 0 : i32
    %c0_i32_1 = arith.constant 0 : i32
    return %c0_i32, %c0_i32_0 : i32, i32
  }
  func.func @transform_19(%arg0: i32) -> (i32, i32) {
    %c0_i32 = arith.constant 0 : i32
    %c0_i32_0 = arith.constant 0 : i32
    %c0_i32_1 = arith.constant 0 : i32
    return %c0_i32, %c0_i32_0 : i32, i32
  }
}

</mosaic_0001>

<bundles_post_ra>
// kernel: bevdet_forward.1
= control target key start
LH: loop header
LB: loop body
LE: loop exit
PB: predicated region body
PF: predicated region fallthrough
CT: control target
= control target key end

     0   :  { %v1687_v0 = vmov 0   ;;  %vm3146_vm0 = vcmask 64512   ;;  %vm3145_vm1 = vcmask 130048   ;;  %vm308_vm2 = vcmask 261120   ;;  %s3122_s6 = inlined_call_operand.vmem [shape: f32[16,1], index: 6, kind: input, shape index: {}]   ;;  %s3123_s0 = inlined_call_operand.vmem [shape: f32[8,384], index: 0, kind: input, shape index: {}]   ;;  %s3124_s5 = inlined_call_operand.vmem [shape: f32[16,8], index: 5, kind: input, shape index: {}]   ;;  %s3125_s10 = inlined_call_operand.vmem [shape: f32[4,1], index: 10, kind: input, shape index: {}]   ;;  %s3126_s14 = inlined_call_operand.vmem [shape: f32[16,1], index: 14, kind: input, shape index: {}]   ;;  %s3127_s18 = inlined_call_operand.vmem [shape: f32[16,1], index: 18, kind: input, shape index: {}]   ;;  %s3128_s8 = inlined_call_operand.vmem [shape: f32[32,1], index: 8, kind: input, shape index: {}]   ;;  %s3129_s12 = inlined_call_operand.vmem [shape: f32[8,1], index: 12, kind: input, shape index: {}]   ;;  %s3130_s16 = inlined_call_operand.vmem [shape: f32[16,1], index: 16, kind: input, shape index: {}]   ;;  %s3131_s7 = inlined_call_operand.vmem [shape: f32[32,16], index: 7, kind: input, shape index: {}]   ;;  %s3132_s1 = inlined_call_operand.vmem [shape: s32[1,256], index: 1, kind: input, shape index: {}]   ;;  %s3133_s9 = inlined_call_operand.vmem [shape: f32[4,32], index: 9, kind: input, shape index: {}]   ;;  %s3134_s11 = inlined_call_operand.vmem [shape: f32[8,32], index: 11, kind: input, shape index: {}]   ;;  %s3135_s2 = inlined_call_operand.vmem [shape: s32[1,256], index: 2, kind: input, shape index: {}]   ;;  %s3136_s3 = inlined_call_operand.vmem [shape: f32[1,256], index: 3, kind: input, shape index: {}]   ;;  %s3137_s4 = inlined_call_operand.vmem [shape: f32[8,256], index: 4, kind: input, shape index: {}]   ;;  %s3138_s13 = inlined_call_operand.vmem [shape: f32[16,8], index: 13, kind: input, shape index: {}]   ;;  %s3139_s15 = inlined_call_operand.vmem [shape: f32[16,16], index: 15, kind: input, shape index: {}]   ;;  %s3140_s17 = inlined_call_operand.vmem [shape: f32[16,16], index: 17, kind: input, shape index: {}]   ;;  %s3141_s19 = inlined_call_operand.vmem [shape: f32[16,256], index: 19, kind: output, shape index: {}]  }
   0x1   :  { %3224 = sst [smem:[#allocation2_spill]] %s3122_s6  ;;  %1672 = vset.pattern.permute.xlu0 %v1687_v0  ;;  %1673 = vset.pattern.permute.xlu1 %v1687_v0  ;;  %v1129_v9 = vld [vmem:[%s3126_s14] sm:$0xff]  ;;  %v168_v11 = vld [vmem:[%s3128_s8 + $0x18] sm:$0xff]  ;;  %v167_v12 = vld [vmem:[%s3128_s8 + $0x10] sm:$0xff] }
   0x2   :  { %3225 = sst [smem:[#allocation3_spill]] %s3123_s0  ;;  %1674 = vset.pattern.permute.xlu2 %v1687_v0  ;;  %v1269_v10 = vld [vmem:[%s3127_s18] sm:$0xff]  ;;  %186 = vperm.xlu1 %1673, %v168_v11   ;;  %v1200_v21 = vld [vmem:[%s3130_s16 + $0x8] sm:$0xff]  ;;  %v163_v40 = vld [vmem:[%s3131_s7 + $0x10] sm:$0xff] }
   0x3   :  { %3226 = sst [smem:[#allocation4_spill]] %s3124_s5  ;;  %v373_v16 = vld [vmem:[%s3129_s12] sm:$0xff]  ;;  %v166_v32 = vld [vmem:[%s3128_s8 + $0x8] sm:$0xff]  ;;  %v164_v42 = vld [vmem:[%s3131_s7 + $0x18] sm:$0xff] }
   0x4   :  { %3227 = sst [smem:[#allocation5_spill]] %s3125_s10  ;;  %v161_v30 = vld [vmem:[%s3131_s7] sm:$0xff]  ;;  %v1270_v35 = vld [vmem:[%s3127_s18 + $0x8] sm:$0xff]  ;;  %176 = vperm.xlu2 %1674, %v166_v32  }
   0x5   :  { %s3228_s20 = sld [smem:[#allocation2_spill]]  ;;  %v162_v38 = vld [vmem:[%s3131_s7 + $0x8] sm:$0xff]  ;;  %v165_v39 = vld [vmem:[%s3128_s8] sm:$0xff] }
   0x6   :  { %s3229_s22 = sld [smem:[#allocation3_spill]]  ;;  %v1130_v41 = vld [vmem:[%s3126_s14 + $0x8] sm:$0xff]  ;;  %v1199_v43 = vld [vmem:[%s3130_s16] sm:$0xff] }
   0x7   :  { %s3230_s27 = sld [smem:[#allocation4_spill]] }
   0xa   :  { %181 = vperm.xlu1 %1673, %v167_v12  }
   0xb   :  { %v68_v1 = vld [vmem:[%s3228_s20 + $0x8] sm:$0xff]  ;;  %v67_v6 = vld [vmem:[%s3228_s20] sm:$0xff] }
   0xc   :  { %v62_v2 = vld [vmem:[%s3229_s22] sm:$0xff]  ;;  %v63_v3 = vld [vmem:[%s3229_s22 + $0x8] sm:$0xff]  ;;  %76 = vperm.xlu0 %1672, %v68_v1   ;;  %v64_v4 = vld [vmem:[%s3229_s22 + $0x10] sm:$0xff]  ;;  %s3231_s22 = sld [smem:[#allocation5_spill]]  ;;  %171 = vperm.xlu2 %1674, %v165_v39  }
   0xd   :  { %101 = vmatpush.msra.mxu0 %v62_v2  ;;  %v65_v5 = vld [vmem:[%s3230_s27] sm:$0xff]  ;;  %124 = vmatpush.msra.mxu1 %v63_v3  ;;  %v66_v7 = vld [vmem:[%s3230_s27 + $0x8] sm:$0xff]  ;;  %v500_v3 = vlaneseq }
   0xe   :  { %147 = vmatpush.msra.mxu2 %v64_v4  ;;  %1341 = vmatmul.msk.f32.vlgmr.msra.gmra.mxu0 %vm3146_vm0, %v65_v5  ;;  %v549_v4 = vld [vmem:[%s3132_s1] sm:$0x3] }
   0xf   :  { %1343 = vmatmul.msk.f32.vlgmr.msra.gmra.mxu1 %vm3146_vm0, %v65_v5  ;;  %1345 = vmatmul.msk.f32.vlgmr.msra.gmra.mxu2 %vm3146_vm0, %v65_v5 }
  0x12   :  { %v302_v8 = vld [vmem:[%s3231_s22] sm:$0xf]  ;;  %376 = vperm.xlu1 %1673, %v373_v16  }
  0x13   :  { %v1905_v16 = vld [vmem:[%s3134_s11] sm:$0xff] }
  0x14   :  { %71 = vperm.xlu0 %1672, %v67_v6   ;;  %1138 = vperm.xlu2 %1674, %v1130_v41  }
  0x16   :  { %1342 = vmatmul.msk.f32.gmra.mxu0 %vm3146_vm0, %v66_v7 }
  0x17   :  { %1344 = vmatmul.msk.f32.gmra.mxu1 %vm3146_vm0, %v66_v7  ;;  %1346 = vmatmul.msk.f32.gmra.mxu2 %vm3146_vm0, %v66_v7 }
  0x1a   :  { %1208 = vperm.xlu1 %1673, %v1200_v21  }
  0x1c   :  { %305 = vperm.xlu0 %1672, %v302_v8   ;;  %1203 = vperm.xlu2 %1674, %v1199_v43   ;;  %v1884_v8 = vshrl.u32 %v500_v3, 7 }
  0x1e   :  { %v1918_v21 = vadd.s32 240, %v1884_v8  ;;  %v1966_v32 = vadd.s32 224, %v1884_v8  ;;  %v2006_v39 = vadd.s32 208, %v1884_v8  ;;  %v2026_v41 = vadd.s32 200, %v1884_v8 }
  0x1f   :  { %v2056_v43 = vadd.s32 192, %v1884_v8  ;;  %v2344_v3 = vadd.s32 312, %v1884_v8 }
  0x22   :  { %1278 = vperm.xlu1 %1673, %v1270_v35  }
  0x24   :  { %1133 = vperm.xlu0 %1672, %v1129_v9   ;;  %v1886_v9 = vperm.slane %v549_v4, 0 }
  0x26   :  { %vm3156_vm6 = vcmp.eq.s32.totalorder %v1918_v21, %v1886_v9  ;;  %vm3150_vm10 = vcmp.eq.s32.totalorder %v1966_v32, %v1886_v9 }
  0x2c   :  { %1273 = vperm.xlu0 %1672, %v1269_v10  }
  0x5e   :  { %v177_v51 = vpop.permute.xlu2 %176 }
  0x66   :  { %v172_v56 = vpop.permute.xlu2 %171 }
  0x74   :  { %v187_v50 = vpop.permute.xlu1 %186 }
  0x7c   :  { %v182_v55 = vpop.permute.xlu1 %181 }
  0x7e   :  { %v77_v13 = vpop.permute.xlu0 %76 }
  0x86   :  { %v72_v17 = vpop.permute.xlu0 %71 }
  0x8b   :  { %v103_v14 = vpop.f32.mrf.mxu0 }
  0x8c   :  { %v126_v15 = vpop.f32.mrf.mxu1  ;;  %v104_v22 = vadd.f32 %v103_v14, %v72_v17 }
  0x8d   :  { %v127_v23 = vadd.f32 %v126_v15, %v72_v17  ;;  %v1900_v15 = vld [vmem:[%s3133_s9] sm:$0xf] }
  0x8e   :  { %v155_v28 = vmax.f32 %v104_v22, 0.0  ;;  %v1925_v22 = vadd.s32 104, %v1884_v8 }
  0x8f   :  { %v156_v29 = vmax.f32 %v127_v23, 0.0  ;;  %v1928_v23 = vadd.s32 232, %v1884_v8 }
  0x90   :  { %vm578_vm7 = vcmp.eq.s32.totalorder %v1925_v22, %v1886_v9 }
  0x91   :  { %vm3154_vm8 = vcmp.eq.s32.totalorder %v1928_v23, %v1886_v9 }
  0x92   :  { %v149_v18 = vpop.f32.mrf.mxu2 }
  0x93   :  { %v106_v19 = vpop.f32.mrf.mxu0  ;;  %v150_v33 = vadd.f32 %v149_v18, %v72_v17  ;;  %v1908_v17 = vadd.s32 120, %v1884_v8  ;;  %v1911_v18 = vadd.s32 248, %v1884_v8 }
  0x94   :  { %v129_v20 = vpop.f32.mrf.mxu1  ;;  %v107_v25 = vadd.f32 %v106_v19, %v77_v13 }
  0x95   :  { %v130_v24 = vadd.f32 %v129_v20, %v77_v13  ;;  %v157_v37 = vmax.f32 %v150_v33, 0.0  ;;  %v1915_v20 = vadd.s32 112, %v1884_v8  ;;  %vm582_vm3 = vcmp.eq.s32.totalorder %v1908_v17, %v1886_v9 }
  0x96   :  { %v158_v27 = vmax.f32 %v107_v25, 0.0  ;;  %vm3157_vm4 = vcmp.eq.s32.totalorder %v1911_v18, %v1886_v9  ;;  %v1976_v33 = vperm.slane %v549_v4, 1  ;;  %v2371_v4 = vadd.s32 304, %v1884_v8 }
  0x97   :  { %v159_v26 = vmax.f32 %v130_v24, 0.0  ;;  %vm580_vm5 = vcmp.eq.s32.totalorder %v1915_v20, %v1886_v9 }
  0x98   :  { %216 = vmatpush.msra.mxu3 %v158_v27  ;;  %vm3147_vm11 = vcmp.eq.s32.totalorder %v1908_v17, %v1976_v33  ;;  %vm3149_vm14 = vcmp.eq.s32.totalorder %v1915_v20, %v1976_v33  ;;  %vm3151_vm0 = vcmp.eq.s32.totalorder %v1925_v22, %v1976_v33 }
  0x99   :  { %245 = vmatpush.msrb.mxu0 %v159_v26 }
  0x9a   :  { %v152_v31 = vpop.f32.mrf.mxu2  ;;  %217 = vmatpush.msra.mxu3 %v155_v28 }
  0x9b   :  { %246 = vmatpush.msrb.mxu0 %v156_v29  ;;  %v153_v34 = vadd.f32 %v152_v31, %v77_v13  ;;  %1347 = vmatmul.msk.f32.vlgmr.msra.gmra.mxu3 %vm3145_vm1, %v161_v30  ;;  %v1688_v29 = vmov 1.0  }
  0x9c   :  { %1351 = vmatmul.msk.f32.vlgmr.msrb.gmra.mxu0 %vm3145_vm1, %v161_v30 }
  0x9d   :  { %v160_v36 = vmax.f32 %v153_v34, 0.0  ;;  %1461 = vmatpush.msk.msra.mxu0 %vm582_vm3, %v1688_v29  ;;  %v1979_v34 = vadd.s32 88, %v1884_v8 }
  0x9f   :  { %274 = vmatpush.msrb.mxu1 %v160_v36  ;;  %1462 = vmatpush.msk.msra.mxu0 %vm580_vm5, %v1688_v29  ;;  %vm574_vm12 = vcmp.eq.s32.totalorder %v1979_v34, %v1886_v9 }
  0xa1   :  { %275 = vmatpush.msrb.mxu1 %v157_v37  ;;  %v1986_v37 = vadd.s32 216, %v1884_v8  ;;  %1463 = vmatpush.msk.msra.mxu0 %vm578_vm7, %v1688_v29 }
  0xa2   :  { %1355 = vmatmul.msk.f32.vlgmr.msrb.gmra.mxu1 %vm3145_vm1, %v161_v30  ;;  %v1956_v30 = vadd.s32 96, %v1884_v8 }
  0xa3   :  { %1348 = vmatmul.msk.f32.gmra.mxu3 %vm3145_vm1, %v162_v38  ;;  %1477 = vmatpush.msk.msra.mxu1 %vm3157_vm4, %v1688_v29  ;;  %vm3148_vm13 = vcmp.eq.s32.totalorder %v1986_v37, %v1886_v9 }
  0xa4   :  { %1352 = vmatmul.msk.f32.gmra.mxu0 %vm3145_vm1, %v162_v38  ;;  %vm576_vm9 = vcmp.eq.s32.totalorder %v1956_v30, %v1886_v9 }
  0xa5   :  { %1478 = vmatpush.msk.msra.mxu1 %vm3156_vm6, %v1688_v29  ;;  %1464 = vmatpush.msk.msra.mxu0 %vm576_vm9, %v1688_v29 }
  0xa7   :  { %1479 = vmatpush.msk.msra.mxu1 %vm3154_vm8, %v1688_v29  ;;  %1465 = vmatpush.msk.msra.mxu0 %vm574_vm12, %v1688_v29 }
  0xa9   :  { %1480 = vmatpush.msk.msra.mxu1 %vm3150_vm10, %v1688_v29 }
  0xaa   :  { %1356 = vmatmul.msk.f32.gmra.mxu1 %vm3145_vm1, %v162_v38  ;;  %v1999_v38 = vadd.s32 80, %v1884_v8 }
  0xab   :  { %1349 = vmatmul.msk.f32.gmra.mxu3 %vm3145_vm1, %v163_v40  ;;  %1481 = vmatpush.msk.msra.mxu1 %vm3148_vm13, %v1688_v29  ;;  %vm3153_vm13 = vcmp.eq.s32.totalorder %v2026_v41, %v1886_v9 }
  0xac   :  { %1353 = vmatmul.msk.f32.gmra.mxu0 %vm3145_vm1, %v163_v40  ;;  %vm572_vm15 = vcmp.eq.s32.totalorder %v1999_v38, %v1886_v9 }
  0xad   :  { %1466 = vmatpush.msk.msra.mxu0 %vm572_vm15, %v1688_v29 }
  0xb2   :  { %1357 = vmatmul.msk.f32.gmra.mxu1 %vm3145_vm1, %v163_v40  ;;  %v2023_v40 = vadd.s32 72, %v1884_v8 }
  0xb3   :  { %1350 = vmatmul.msk.f32.gmra.mxu3 %vm3145_vm1, %v164_v42 }
  0xb4   :  { %1354 = vmatmul.msk.f32.gmra.mxu0 %vm3145_vm1, %v164_v42 }
  0xba   :  { %1358 = vmatmul.msk.f32.gmra.mxu1 %vm3145_vm1, %v164_v42  ;;  %vm3152_vm1 = vcmp.eq.s32.totalorder %v2006_v39, %v1886_v9  ;;  %v2047_v42 = vadd.s32 64, %v1884_v8 }
  0xbb   :  { %1482 = vmatpush.msk.msra.mxu1 %vm3152_vm1, %v1688_v29  ;;  %vm3159_vm1 = vcmp.eq.s32.totalorder %v1979_v34, %v1976_v33 }
  0xbc   :  { %vm3165_vm10 = vcmp.eq.s32.totalorder %v2047_v42, %v1886_v9 }
  0xbd   :  { %1483 = vmatpush.msk.msra.mxu1 %vm3153_vm13, %v1688_v29 }
 0x119   :  { %v248_v44 = vpop.f32.mrf.mxu0 }
 0x11a   :  { %v1930_v24 = vadd.f32 %v248_v44, %v172_v56  ;;  %v2071_v44 = vadd.s32 56, %v1884_v8 }
 0x11c   :  { %v290_v36 = vmax.f32 %v1930_v24, 0.0  ;;  %vm3160_vm13 = vcmp.eq.s32.totalorder %v2071_v44, %v1886_v9 }
 0x11e   :  { %v219_v45 = vpop.f32.mrf.mxu3 }
 0x11f   :  { %v277_v46 = vpop.f32.mrf.mxu1  ;;  %v220_v61 = vadd.f32 %v219_v45, %v172_v56  ;;  %v2080_v45 = vadd.s32 184, %v1884_v8 }
 0x120   :  { %v1932_v25 = vadd.f32 %v277_v46, %v172_v56  ;;  %v2091_v46 = vadd.s32 48, %v1884_v8  ;;  %v2191_v56 = vadd.s32 152, %v1884_v8 }
 0x121   :  { %v251_v47 = vpop.f32.mrf.mxu0  ;;  %v289_v6 = vmax.f32 %v220_v61, 0.0  ;;  %vm3161_vm8 = vcmp.eq.s32.totalorder %v2080_v45, %v1886_v9  ;;  %v2252_v61 = vadd.s32 8, %v1884_v8 }
 0x122   :  { %v1888_v10 = vadd.f32 %v251_v47, %v177_v51  ;;  %v291_v35 = vmax.f32 %v1932_v25, 0.0  ;;  %v2094_v47 = vadd.s32 376, %v1884_v8  ;;  %vm3163_vm6 = vcmp.eq.s32.totalorder %v2091_v46, %v1886_v9 }
 0x124   :  { %v293_v28 = vmax.f32 %v1888_v10, 0.0  ;;  %vm3164_vm4 = vcmp.eq.s32.totalorder %v2094_v47, %v1886_v9  ;;  %v2445_v10 = vadd.s32 272, %v1884_v8 }
 0x126   :  { %v222_v48 = vpop.f32.mrf.mxu3 }
 0x127   :  { %v280_v49 = vpop.f32.mrf.mxu1  ;;  %v223_v62 = vadd.f32 %v222_v48, %v177_v51  ;;  %v2109_v48 = vadd.s32 176, %v1884_v8 }
 0x128   :  { %v1890_v11 = vadd.f32 %v280_v49, %v177_v51  ;;  %v2120_v49 = vadd.s32 40, %v1884_v8  ;;  %v2136_v51 = vadd.s32 368, %v1884_v8 }
 0x129   :  { %v254_v52 = vpop.f32.mrf.mxu0  ;;  %v292_v7 = vmax.f32 %v223_v62, 0.0  ;;  %v2255_v62 = vadd.s32 136, %v1884_v8 }
 0x12a   :  { %v1892_v12 = vadd.f32 %v254_v52, %v182_v55  ;;  %v294_v31 = vmax.f32 %v1890_v11, 0.0  ;;  %v2159_v52 = vadd.s32 32, %v1884_v8  ;;  %v2454_v11 = vadd.s32 264, %v1884_v8 }
 0x12c   :  { %v296_v26 = vmax.f32 %v1892_v12, 0.0  ;;  %v2463_v12 = vadd.s32 256, %v1884_v8 }
 0x12e   :  { %v225_v53 = vpop.f32.mrf.mxu3 }
 0x12f   :  { %v283_v54 = vpop.f32.mrf.mxu1  ;;  %v226_v58 = vadd.f32 %v225_v53, %v182_v55  ;;  %v2162_v53 = vadd.s32 160, %v1884_v8 }
 0x130   :  { %v1894_v13 = vadd.f32 %v283_v54, %v182_v55  ;;  %v2165_v54 = vadd.s32 360, %v1884_v8  ;;  %v2188_v55 = vadd.s32 24, %v1884_v8 }
 0x131   :  { %v257_v60 = vpop.f32.mrf.mxu0  ;;  %v295_v1 = vmax.f32 %v226_v58, 0.0  ;;  %v2221_v58 = vadd.s32 16, %v1884_v8 }
 0x132   :  { %v1877_v2 = vadd.f32 %v257_v60, %v187_v50  ;;  %v297_v27 = vmax.f32 %v1894_v13, 0.0  ;;  %v2231_v60 = vadd.s32 344, %v1884_v8  ;;  %v306_v13 = vpop.permute.xlu0 %305 }
 0x134   :  { %v299_v14 = vmax.f32 %v1877_v2, 0.0  ;;  %v2317_v2 = vadd.s32 320, %v1884_v8 }
 0x136   :  { %v228_v57 = vpop.f32.mrf.mxu3 }
 0x137   :  { %v229_v59 = vadd.f32 %v228_v57, %v187_v50  ;;  %v286_v0 = vpop.f32.mrf.mxu1  ;;  %v2200_v57 = vadd.s32 352, %v1884_v8 }
 0x138   :  { %v1882_v5 = vadd.f32 %v286_v0, %v187_v50  ;;  %v2133_v50 = vadd.s32 168, %v1884_v8  ;;  %v2285_v0 = vadd.s32 128, %v1884_v8 }
 0x139   :  { %v298_v63 = vmax.f32 %v229_v59, 0.0  ;;  %v2224_v59 = vadd.s32 144, %v1884_v8 }
 0x13a   :  { %v300_v19 = vmax.f32 %v1882_v5, 0.0  ;;  %v2398_v5 = vadd.s32 296, %v1884_v8 }
 0x13b   :  { %324 = vmatpush.msrb.mxu2 %v298_v63  ;;  %394 = vmatpush.msrb.mxu3 %v298_v63  ;;  %v2260_v63 = vadd.s32 336, %v1884_v8 }
 0x13d   :  { %325 = vmatpush.msrb.mxu2 %v295_v1  ;;  %395 = vmatpush.msrb.mxu3 %v295_v1  ;;  %v2290_v1 = vadd.s32 328, %v1884_v8 }
 0x13f   :  { %326 = vmatpush.msrb.mxu2 %v292_v7  ;;  %396 = vmatpush.msrb.mxu3 %v292_v7  ;;  %v2436_v7 = vadd.s32 280, %v1884_v8 }
 0x141   :  { %327 = vmatpush.msrb.mxu2 %v289_v6  ;;  %397 = vmatpush.msrb.mxu3 %v289_v6  ;;  %v2419_v6 = vadd.s32 288, %v1884_v8 }
 0x142   :  { %1359 = vmatmul.msk.f32.vlgmr.msrb.gmra.mxu2 %vm308_vm2, %v1900_v15  ;;  %1362 = vmatmul.msk.f32.vlgmr.msrb.gmra.mxu3 %vm308_vm2, %v1905_v16 }
 0x143   :  { %344 = vmatpush.msra.mxu2 %v299_v14  ;;  %434 = vmatpush.msra.mxu3 %v300_v19 }
 0x145   :  { %345 = vmatpush.msra.mxu2 %v296_v26  ;;  %435 = vmatpush.msra.mxu3 %v297_v27 }
 0x147   :  { %346 = vmatpush.msra.mxu2 %v293_v28  ;;  %436 = vmatpush.msra.mxu3 %v294_v31 }
 0x149   :  { %347 = vmatpush.msra.mxu2 %v290_v36  ;;  %437 = vmatpush.msra.mxu3 %v291_v35 }
 0x14a   :  { %1364 = vmatmul.msk.f32.vlgmr.msra.gmra.mxu3 %vm308_vm2, %v1905_v16  ;;  %1360 = vmatmul.msk.f32.vlgmr.msra.gmra.mxu2 %vm308_vm2, %v1900_v15 }
 0x14b   :  { %364 = vmatpush.msrb.mxu2 %v300_v19  ;;  %1509 = vmatpush.msk.msrb.mxu3 %vm3147_vm11, %v1688_v29  ;;  %vm570_vm11 = vcmp.eq.s32.totalorder %v2023_v40, %v1886_v9 }
 0x14c   :  { %1467 = vmatpush.msk.msra.mxu0 %vm570_vm11, %v1688_v29 }
 0x14d   :  { %365 = vmatpush.msrb.mxu2 %v297_v27  ;;  %1510 = vmatpush.msk.msrb.mxu3 %vm3149_vm14, %v1688_v29  ;;  %vm3155_vm14 = vcmp.eq.s32.totalorder %v1956_v30, %v1976_v33 }
 0x14e   :  { %1468 = vmatpush.msk.msra.mxu0 %vm3165_vm10, %v1688_v29  ;;  %vm3173_vm10 = vcmp.eq.s32.totalorder %v2162_v53, %v1886_v9 }
 0x14f   :  { %366 = vmatpush.msrb.mxu2 %v294_v31  ;;  %1511 = vmatpush.msk.msrb.mxu3 %vm3151_vm0, %v1688_v29  ;;  %vm3158_vm0 = vcmp.eq.s32.totalorder %v2056_v43, %v1886_v9 }
 0x150   :  { %1484 = vmatpush.msk.msra.mxu1 %vm3158_vm0, %v1688_v29  ;;  %1469 = vmatpush.msk.msra.mxu0 %vm3160_vm13, %v1688_v29  ;;  %vm3167_vm0 = vcmp.eq.s32.totalorder %v2109_v48, %v1886_v9  ;;  %vm3168_vm13 = vcmp.eq.s32.totalorder %v2120_v49, %v1886_v9 }
 0x151   :  { %367 = vmatpush.msrb.mxu2 %v291_v35  ;;  %1512 = vmatpush.msk.msrb.mxu3 %vm3155_vm14, %v1688_v29  ;;  %vm3162_vm14 = vcmp.eq.s32.totalorder %v1999_v38, %v1976_v33 }
 0x152   :  { %1361 = vmatmul.msk.f32.vlgmr.msrb.gmra.mxu2 %vm308_vm2, %v1900_v15  ;;  %1485 = vmatpush.msk.msra.mxu1 %vm3161_vm8, %v1688_v29  ;;  %vm3171_vm8 = vcmp.eq.s32.totalorder %v2133_v50, %v1886_v9 }
 0x153   :  { %414 = vmatpush.msra.mxu2 %v299_v14  ;;  %1513 = vmatpush.msk.msrb.mxu3 %vm3159_vm1, %v1688_v29  ;;  %vm3166_vm1 = vcmp.eq.s32.totalorder %v2023_v40, %v1976_v33  ;;  %v2781_v14 = vpop.permute.xlu1 %376 }
 0x154   :  { %1470 = vmatpush.msk.msra.mxu0 %vm3163_vm6, %v1688_v29  ;;  %1486 = vmatpush.msk.msra.mxu1 %vm3167_vm0, %v1688_v29  ;;  %vm3170_vm6 = vcmp.eq.s32.totalorder %v2047_v42, %v1976_v33  ;;  %vm3174_vm0 = vcmp.eq.s32.totalorder %v2071_v44, %v1976_v33 }
 0x155   :  { %415 = vmatpush.msra.mxu2 %v296_v26  ;;  %1514 = vmatpush.msk.msrb.mxu3 %vm3162_vm14, %v1688_v29  ;;  %vm3169_vm14 = vcmp.eq.s32.totalorder %v2136_v51, %v1886_v9 }
 0x156   :  { %1471 = vmatpush.msk.msra.mxu0 %vm3168_vm13, %v1688_v29  ;;  %1487 = vmatpush.msk.msra.mxu1 %vm3171_vm8, %v1688_v29  ;;  %vm3177_vm13 = vcmp.eq.s32.totalorder %v2191_v56, %v1886_v9  ;;  %vm3180_vm8 = vcmp.eq.s32.totalorder %v2221_v58, %v1886_v9 }
 0x157   :  { %416 = vmatpush.msra.mxu2 %v293_v28  ;;  %1515 = vmatpush.msk.msrb.mxu3 %vm3166_vm1, %v1688_v29  ;;  %vm3175_vm1 = vcmp.eq.s32.totalorder %v2165_v54, %v1886_v9 }
 0x158   :  { %1488 = vmatpush.msk.msra.mxu1 %vm3173_vm10, %v1688_v29  ;;  %vm3183_vm10 = vcmp.eq.s32.totalorder %v2231_v60, %v1886_v9 }
 0x159   :  { %417 = vmatpush.msra.mxu2 %v290_v36  ;;  %1516 = vmatpush.msk.msrb.mxu3 %vm3170_vm6, %v1688_v29  ;;  %vm3178_vm6 = vcmp.eq.s32.totalorder %v2091_v46, %v1976_v33 }
 0x15a   :  { %1363 = vmatmul.msk.f32.vlgmr.msra.gmra.mxu2 %vm308_vm2, %v1905_v16  ;;  %vm3176_vm2 = vcmp.eq.s32.totalorder %v2188_v55, %v1886_v9  ;;  %1489 = vmatpush.msk.msra.mxu1 %vm3177_vm13, %v1688_v29  ;;  %vm3187_vm13 = vcmp.eq.s32.totalorder %v2260_v63, %v1886_v9 }
 0x15b   :  { %1493 = vmatpush.msk.msrb.mxu2 %vm3164_vm4, %v1688_v29  ;;  %vm3172_vm4 = vcmp.eq.s32.totalorder %v2159_v52, %v1886_v9  ;;  %1517 = vmatpush.msk.msrb.mxu3 %vm3174_vm0, %v1688_v29  ;;  %vm3182_vm0 = vcmp.eq.s32.totalorder %v2120_v49, %v1976_v33 }
 0x15c   :  { %1472 = vmatpush.msk.msra.mxu0 %vm3172_vm4, %v1688_v29  ;;  %vm3181_vm4 = vcmp.eq.s32.totalorder %v2224_v59, %v1886_v9 }
 0x15d   :  { %1494 = vmatpush.msk.msrb.mxu2 %vm3169_vm14, %v1688_v29  ;;  %vm3179_vm14 = vcmp.eq.s32.totalorder %v2200_v57, %v1886_v9  ;;  %1518 = vmatpush.msk.msrb.mxu3 %vm3178_vm6, %v1688_v29  ;;  %vm3186_vm6 = vcmp.eq.s32.totalorder %v2159_v52, %v1976_v33 }
 0x15e   :  { %1473 = vmatpush.msk.msra.mxu0 %vm3176_vm2, %v1688_v29  ;;  %vm3185_vm2 = vcmp.eq.s32.totalorder %v2255_v62, %v1886_v9  ;;  %1490 = vmatpush.msk.msra.mxu1 %vm3181_vm4, %v1688_v29  ;;  %vm634_vm4 = vcmp.eq.s32.totalorder %v2290_v1, %v1886_v9 }
 0x15f   :  { %1495 = vmatpush.msk.msrb.mxu2 %vm3175_vm1, %v1688_v29  ;;  %vm3184_vm1 = vcmp.eq.s32.totalorder %v2252_v61, %v1886_v9  ;;  %1519 = vmatpush.msk.msrb.mxu3 %vm3182_vm0, %v1688_v29  ;;  %vm3190_vm0 = vcmp.eq.s32.totalorder %v2188_v55, %v1976_v33 }
 0x160   :  { %1474 = vmatpush.msk.msra.mxu0 %vm3180_vm8, %v1688_v29  ;;  %vm3189_vm8 = vcmp.eq.s32.totalorder %v2285_v0, %v1886_v9  ;;  %1491 = vmatpush.msk.msra.mxu1 %vm3185_vm2, %v1688_v29  ;;  %vm3192_vm2 = vcmp.eq.s32.totalorder %v2317_v2, %v1886_v9 }
 0x161   :  { %1496 = vmatpush.msk.msrb.mxu2 %vm3179_vm14, %v1688_v29  ;;  %vm3188_vm14 = vcmp.eq.s32.totalorder %v1884_v8, %v1886_v9  ;;  %1520 = vmatpush.msk.msrb.mxu3 %vm3186_vm6, %v1688_v29  ;;  %vm3191_vm6 = vcmp.eq.s32.totalorder %v2221_v58, %v1976_v33 }
 0x162   :  { %1475 = vmatpush.msk.msra.mxu0 %vm3184_vm1, %v1688_v29  ;;  %vm647_vm1 = vcmp.eq.s32.totalorder %v2094_v47, %v1976_v33  ;;  %1492 = vmatpush.msk.msra.mxu1 %vm3189_vm8, %v1688_v29  ;;  %vm3193_vm8 = vcmp.eq.s32.totalorder %v2344_v3, %v1886_v9 }
 0x163   :  { %1497 = vmatpush.msk.msrb.mxu2 %vm3183_vm10, %v1688_v29  ;;  %vm615_vm10 = vcmp.eq.s32.totalorder %v1911_v18, %v1976_v33  ;;  %1521 = vmatpush.msk.msrb.mxu3 %vm3190_vm0, %v1688_v29  ;;  %vm3194_vm0 = vcmp.eq.s32.totalorder %v2371_v4, %v1886_v9 }
 0x164   :  { %1476 = vmatpush.msk.msra.mxu0 %vm3188_vm14, %v1688_v29  ;;  %vm645_vm14 = vcmp.eq.s32.totalorder %v2136_v51, %v1976_v33  ;;  %1541 = vmatpush.msk.msrb.mxu1 %vm647_vm1, %v1688_v29 }
 0x165   :  { %1498 = vmatpush.msk.msrb.mxu2 %vm3187_vm13, %v1688_v29  ;;  %vm613_vm13 = vcmp.eq.s32.totalorder %v1918_v21, %v1976_v33  ;;  %1522 = vmatpush.msk.msrb.mxu3 %vm3191_vm6, %v1688_v29  ;;  %vm3195_vm6 = vcmp.eq.s32.totalorder %v2398_v5, %v1886_v9 }
 0x166   :  { %1525 = vmatpush.msk.msrb.mxu0 %vm615_vm10, %v1688_v29  ;;  %1542 = vmatpush.msk.msrb.mxu1 %vm645_vm14, %v1688_v29 }
 0x167   :  { %1499 = vmatpush.msk.msrb.mxu2 %vm634_vm4, %v1688_v29 }
 0x168   :  { %1526 = vmatpush.msk.msrb.mxu0 %vm613_vm13, %v1688_v29 }
 0x169   :  { %1500 = vmatpush.msk.msrb.mxu2 %vm3192_vm2, %v1688_v29  ;;  %vm3196_vm2 = vcmp.eq.s32.totalorder %v2419_v6, %v1886_v9 }
 0x16b   :  { %1501 = vmatpush.msk.msrb.mxu2 %vm3193_vm8, %v1688_v29  ;;  %vm3202_vm8 = vcmp.eq.s32.totalorder %v2436_v7, %v1886_v9 }
 0x16d   :  { %1502 = vmatpush.msk.msrb.mxu2 %vm3194_vm0, %v1688_v29  ;;  %vm3201_vm0 = vcmp.eq.s32.totalorder %v2445_v10, %v1886_v9 }
 0x16f   :  { %1503 = vmatpush.msk.msrb.mxu2 %vm3195_vm6, %v1688_v29  ;;  %vm3200_vm6 = vcmp.eq.s32.totalorder %v2454_v11, %v1886_v9 }
 0x171   :  { %1504 = vmatpush.msk.msrb.mxu2 %vm3196_vm2, %v1688_v29  ;;  %vm3199_vm2 = vcmp.eq.s32.totalorder %v2463_v12, %v1886_v9 }
 0x173   :  { %1505 = vmatpush.msk.msrb.mxu2 %vm3202_vm8, %v1688_v29  ;;  %vm635_vm8 = vcmp.eq.s32.totalorder %v2290_v1, %v1976_v33 }
 0x175   :  { %1506 = vmatpush.msk.msrb.mxu2 %vm3201_vm0, %v1688_v29  ;;  %vm3205_vm0 = vcmp.eq.s32.totalorder %v2026_v41, %v1976_v33 }
 0x177   :  { %1507 = vmatpush.msk.msrb.mxu2 %vm3200_vm6, %v1688_v29  ;;  %vm637_vm6 = vcmp.eq.s32.totalorder %v2260_v63, %v1976_v33 }
 0x179   :  { %1508 = vmatpush.msk.msrb.mxu2 %vm3199_vm2, %v1688_v29  ;;  %vm3203_vm2 = vcmp.eq.s32.totalorder %v2006_v39, %v1976_v33 }
 0x17b   :  { %1557 = vmatpush.msk.msra.mxu2 %vm582_vm3, %v1688_v29  ;;  %vm3232_vm3 = vcmp.eq.s32.totalorder %v2047_v42, %v1886_v9 }
 0x17d   :  { %1558 = vmatpush.msk.msra.mxu2 %vm580_vm5, %v1688_v29  ;;  %vm3233_vm5 = vcmp.eq.s32.totalorder %v2071_v44, %v1886_v9 }
 0x17f   :  { %1559 = vmatpush.msk.msra.mxu2 %vm578_vm7, %v1688_v29  ;;  %vm3234_vm7 = vcmp.eq.s32.totalorder %v2091_v46, %v1886_v9 }
 0x181   :  { %1560 = vmatpush.msk.msra.mxu2 %vm576_vm9, %v1688_v29  ;;  %vm3235_vm9 = vcmp.eq.s32.totalorder %v2120_v49, %v1886_v9 }
 0x183   :  { %1561 = vmatpush.msk.msra.mxu2 %vm574_vm12, %v1688_v29  ;;  %vm3237_vm12 = vcmp.eq.s32.totalorder %v2188_v55, %v1886_v9 }
 0x185   :  { %1562 = vmatpush.msk.msra.mxu2 %vm572_vm15, %v1688_v29  ;;  %vm3238_vm15 = vcmp.eq.s32.totalorder %v2221_v58, %v1886_v9 }
 0x187   :  { %1563 = vmatpush.msk.msra.mxu2 %vm570_vm11, %v1688_v29  ;;  %vm3236_vm11 = vcmp.eq.s32.totalorder %v2159_v52, %v1886_v9 }
 0x189   :  { %1564 = vmatpush.msk.msra.mxu2 %vm3232_vm3, %v1688_v29  ;;  %vm3239_vm3 = vcmp.eq.s32.totalorder %v2252_v61, %v1886_v9 }
 0x18b   :  { %1565 = vmatpush.msk.msra.mxu2 %vm3233_vm5, %v1688_v29  ;;  %vm3240_vm5 = vcmp.eq.s32.totalorder %v1884_v8, %v1886_v9 }
 0x18d   :  { %1566 = vmatpush.msk.msra.mxu2 %vm3234_vm7, %v1688_v29  ;;  %vm3197_vm7 = vcmp.eq.s32.totalorder %v2252_v61, %v1976_v33 }
 0x18e   :  { %1523 = vmatpush.msk.msrb.mxu3 %vm3197_vm7, %v1688_v29  ;;  %vm3204_vm7 = vcmp.eq.s32.totalorder %v1986_v37, %v1976_v33 }
 0x18f   :  { %1567 = vmatpush.msk.msra.mxu2 %vm3235_vm9, %v1688_v29  ;;  %vm611_vm9 = vcmp.eq.s32.totalorder %v1928_v23, %v1976_v33 }
 0x190   :  { %1527 = vmatpush.msk.msrb.mxu0 %vm611_vm9, %v1688_v29 }
 0x191   :  { %1568 = vmatpush.msk.msra.mxu2 %vm3236_vm11, %v1688_v29  ;;  %vm643_vm11 = vcmp.eq.s32.totalorder %v2165_v54, %v1976_v33 }
 0x192   :  { %1543 = vmatpush.msk.msrb.mxu1 %vm643_vm11, %v1688_v29 }
 0x193   :  { %1569 = vmatpush.msk.msra.mxu2 %vm3237_vm12, %v1688_v29  ;;  %vm3198_vm12 = vcmp.eq.s32.totalorder %v1884_v8, %v1976_v33 }
 0x194   :  { %1524 = vmatpush.msk.msrb.mxu3 %vm3198_vm12, %v1688_v29  ;;  %vm639_vm12 = vcmp.eq.s32.totalorder %v2231_v60, %v1976_v33 }
 0x195   :  { %1570 = vmatpush.msk.msra.mxu2 %vm3238_vm15, %v1688_v29  ;;  %vm3206_vm15 = vcmp.eq.s32.totalorder %v1966_v32, %v1976_v33 }
 0x196   :  { %1528 = vmatpush.msk.msrb.mxu0 %vm3206_vm15, %v1688_v29  ;;  %vm3210_vm15 = vcmp.eq.s32.totalorder %v2344_v3, %v1976_v33 }
 0x197   :  { %1571 = vmatpush.msk.msra.mxu2 %vm3239_vm3, %v1688_v29  ;;  %vm641_vm3 = vcmp.eq.s32.totalorder %v2200_v57, %v1976_v33 }
 0x198   :  { %1544 = vmatpush.msk.msrb.mxu1 %vm641_vm3, %v1688_v29  ;;  %1529 = vmatpush.msk.msrb.mxu0 %vm3204_vm7, %v1688_v29  ;;  %vm3208_vm7 = vcmp.eq.s32.totalorder %v2317_v2, %v1976_v33 }
 0x199   :  { %1572 = vmatpush.msk.msra.mxu2 %vm3240_vm5, %v1688_v29  ;;  %vm3241_vm5 = vcmp.eq.s32.totalorder %v1911_v18, %v1886_v9 }
 0x19a   :  { %1573 = vmatpush.msk.msra.mxu3 %vm3241_vm5, %v1688_v29  ;;  %1545 = vmatpush.msk.msrb.mxu1 %vm639_vm12, %v1688_v29  ;;  %vm3242_vm5 = vcmp.eq.s32.totalorder %v1918_v21, %v1886_v9 }
 0x19b   :  { %1530 = vmatpush.msk.msrb.mxu0 %vm3203_vm2, %v1688_v29  ;;  %vm3207_vm2 = vcmp.eq.s32.totalorder %v2056_v43, %v1976_v33 }
 0x19c   :  { %1574 = vmatpush.msk.msra.mxu3 %vm3242_vm5, %v1688_v29  ;;  %1546 = vmatpush.msk.msrb.mxu1 %vm637_vm6, %v1688_v29  ;;  %vm3243_vm5 = vcmp.eq.s32.totalorder %v1928_v23, %v1886_v9 }
 0x19d   :  { %1531 = vmatpush.msk.msrb.mxu0 %vm3205_vm0, %v1688_v29  ;;  %vm3209_vm0 = vcmp.eq.s32.totalorder %v2080_v45, %v1976_v33 }
 0x19e   :  { %1575 = vmatpush.msk.msra.mxu3 %vm3243_vm5, %v1688_v29  ;;  %1547 = vmatpush.msk.msrb.mxu1 %vm635_vm8, %v1688_v29  ;;  %vm3244_vm5 = vcmp.eq.s32.totalorder %v1966_v32, %v1886_v9 }
 0x19f   :  { %1532 = vmatpush.msk.msrb.mxu0 %vm3207_vm2, %v1688_v29  ;;  %vm3211_vm2 = vcmp.eq.s32.totalorder %v2109_v48, %v1976_v33 }
 0x1a0   :  { %1576 = vmatpush.msk.msra.mxu3 %vm3244_vm5, %v1688_v29  ;;  %1548 = vmatpush.msk.msrb.mxu1 %vm3208_vm7, %v1688_v29  ;;  %vm3245_vm5 = vcmp.eq.s32.totalorder %v1986_v37, %v1886_v9  ;;  %vm3212_vm7 = vcmp.eq.s32.totalorder %v2371_v4, %v1976_v33 }
 0x1a1   :  { %1533 = vmatpush.msk.msrb.mxu0 %vm3209_vm0, %v1688_v29  ;;  %vm3213_vm0 = vcmp.eq.s32.totalorder %v2133_v50, %v1976_v33 }
 0x1a2   :  { %1577 = vmatpush.msk.msra.mxu3 %vm3245_vm5, %v1688_v29  ;;  %1549 = vmatpush.msk.msrb.mxu1 %vm3210_vm15, %v1688_v29  ;;  %vm3246_vm5 = vcmp.eq.s32.totalorder %v2006_v39, %v1886_v9  ;;  %vm3214_vm15 = vcmp.eq.s32.totalorder %v2398_v5, %v1976_v33 }
 0x1a3   :  { %1534 = vmatpush.msk.msrb.mxu0 %vm3211_vm2, %v1688_v29  ;;  %vm3215_vm2 = vcmp.eq.s32.totalorder %v2162_v53, %v1976_v33 }
 0x1a4   :  { %1578 = vmatpush.msk.msra.mxu3 %vm3246_vm5, %v1688_v29  ;;  %1550 = vmatpush.msk.msrb.mxu1 %vm3212_vm7, %v1688_v29  ;;  %vm3247_vm5 = vcmp.eq.s32.totalorder %v2026_v41, %v1886_v9  ;;  %vm3216_vm7 = vcmp.eq.s32.totalorder %v2419_v6, %v1976_v33 }
 0x1a5   :  { %1535 = vmatpush.msk.msrb.mxu0 %vm3213_vm0, %v1688_v29  ;;  %vm3217_vm0 = vcmp.eq.s32.totalorder %v2191_v56, %v1976_v33 }
 0x1a6   :  { %1579 = vmatpush.msk.msra.mxu3 %vm3247_vm5, %v1688_v29  ;;  %1551 = vmatpush.msk.msrb.mxu1 %vm3214_vm15, %v1688_v29  ;;  %vm3248_vm5 = vcmp.eq.s32.totalorder %v2056_v43, %v1886_v9  ;;  %vm3218_vm15 = vcmp.eq.s32.totalorder %v2436_v7, %v1976_v33 }
 0x1a7   :  { %1536 = vmatpush.msk.msrb.mxu0 %vm3215_vm2, %v1688_v29  ;;  %vm3219_vm2 = vcmp.eq.s32.totalorder %v2224_v59, %v1976_v33 }
 0x1a8   :  { %1580 = vmatpush.msk.msra.mxu3 %vm3248_vm5, %v1688_v29  ;;  %1552 = vmatpush.msk.msrb.mxu1 %vm3216_vm7, %v1688_v29  ;;  %vm3249_vm5 = vcmp.eq.s32.totalorder %v2080_v45, %v1886_v9  ;;  %vm3220_vm7 = vcmp.eq.s32.totalorder %v2445_v10, %v1976_v33 }
 0x1a9   :  { %1537 = vmatpush.msk.msrb.mxu0 %vm3217_vm0, %v1688_v29  ;;  %vm3221_vm0 = vcmp.eq.s32.totalorder %v2255_v62, %v1976_v33 }
 0x1aa   :  { %1581 = vmatpush.msk.msra.mxu3 %vm3249_vm5, %v1688_v29  ;;  %1553 = vmatpush.msk.msrb.mxu1 %vm3218_vm15, %v1688_v29  ;;  %vm3250_vm5 = vcmp.eq.s32.totalorder %v2109_v48, %v1886_v9  ;;  %vm619_vm15 = vcmp.eq.s32.totalorder %v2454_v11, %v1976_v33 }
 0x1ab   :  { %1538 = vmatpush.msk.msrb.mxu0 %vm3219_vm2, %v1688_v29  ;;  %vm3222_vm2 = vcmp.eq.s32.totalorder %v2285_v0, %v1976_v33 }
 0x1ac   :  { %1582 = vmatpush.msk.msra.mxu3 %vm3250_vm5, %v1688_v29  ;;  %1554 = vmatpush.msk.msrb.mxu1 %vm3220_vm7, %v1688_v29  ;;  %vm3251_vm5 = vcmp.eq.s32.totalorder %v2133_v50, %v1886_v9  ;;  %vm3223_vm7 = vcmp.eq.s32.totalorder %v2463_v12, %v1976_v33 }
 0x1ad   :  { %1539 = vmatpush.msk.msrb.mxu0 %vm3221_vm0, %v1688_v29  ;;  %vm3254_vm0 = vcmp.eq.s32.totalorder %v2224_v59, %v1886_v9 }
 0x1ae   :  { %1583 = vmatpush.msk.msra.mxu3 %vm3251_vm5, %v1688_v29  ;;  %1555 = vmatpush.msk.msrb.mxu1 %vm619_vm15, %v1688_v29  ;;  %vm3252_vm5 = vcmp.eq.s32.totalorder %v2162_v53, %v1886_v9 }
 0x1af   :  { %1540 = vmatpush.msk.msrb.mxu0 %vm3222_vm2, %v1688_v29  ;;  %vm442_vm2 = vcmask 1043456  }
 0x1b0   :  { %1584 = vmatpush.msk.msra.mxu3 %vm3252_vm5, %v1688_v29  ;;  %1556 = vmatpush.msk.msrb.mxu1 %vm3223_vm7, %v1688_v29  ;;  %vm3253_vm5 = vcmp.eq.s32.totalorder %v2191_v56, %v1886_v9  ;;  %vm3255_vm7 = vcmp.eq.s32.totalorder %v2255_v62, %v1886_v9 }
 0x1b2   :  { %1585 = vmatpush.msk.msra.mxu3 %vm3253_vm5, %v1688_v29  ;;  %vm3257_vm5 = vcmp.eq.s32.totalorder %v2094_v47, %v1886_v9 }
 0x1b4   :  { %1586 = vmatpush.msk.msra.mxu3 %vm3254_vm0, %v1688_v29  ;;  %vm3256_vm0 = vcmp.eq.s32.totalorder %v2285_v0, %v1886_v9 }
 0x1b6   :  { %1587 = vmatpush.msk.msra.mxu3 %vm3255_vm7, %v1688_v29  ;;  %vm3258_vm7 = vcmp.eq.s32.totalorder %v2136_v51, %v1886_v9 }
 0x1b8   :  { %1588 = vmatpush.msk.msra.mxu3 %vm3256_vm0, %v1688_v29  ;;  %vm3259_vm0 = vcmp.eq.s32.totalorder %v2165_v54, %v1886_v9 }
 0x1c5   :  { %v329_v15 = vpop.f32.mrf.mxu2  ;;  %v399_v16 = vpop.f32.mrf.mxu3 }
 0x1c6   :  { %v330_v19 = vadd.f32 %v329_v15, %v306_v13  ;;  %v400_v24 = vadd.f32 %v399_v16, %v2781_v14 }
 0x1c8   :  { %v443_v25 = vsel %vm442_vm2, %v330_v19, -inf  ;;  %856 = vmatmul.f32.vlgmr.msra.gmra.mxu0 %v400_v24  ;;  %916 = vmatmul.f32.vlgmr.msrb.gmra.mxu3 %v400_v24 }
 0x1c9   :  { %v444_v26 = vrot.slane %v443_v25, 4  ;;  %1589 = vmatpush.msk.msra.mxu0 %vm3257_vm5, %v1688_v29  ;;  %1637 = vmatpush.msk.msrb.mxu3 %vm647_vm1, %v1688_v29  ;;  %vm3260_vm1 = vcmp.eq.s32.totalorder %v2200_v57, %v1886_v9  ;;  %vm3271_vm5 = vcmp.eq.s32.totalorder %v2371_v4, %v1976_v33 }
 0x1cb   :  { %v445_v27 = vmax.f32 %v443_v25, %v444_v26  ;;  %1590 = vmatpush.msk.msra.mxu0 %vm3258_vm7, %v1688_v29  ;;  %1638 = vmatpush.msk.msrb.mxu3 %vm645_vm14, %v1688_v29  ;;  %vm3261_vm14 = vcmp.eq.s32.totalorder %v2231_v60, %v1886_v9  ;;  %vm3272_vm7 = vcmp.eq.s32.totalorder %v2026_v41, %v1976_v33 }
 0x1cd   :  { %v446_v28 = vrot.slane %v445_v27, 2  ;;  %v439_v31 = vpop.f32.mrf.mxu3  ;;  %1591 = vmatpush.msk.msra.mxu0 %vm3259_vm0, %v1688_v29  ;;  %v349_v35 = vpop.f32.mrf.mxu2  ;;  %1639 = vmatpush.msk.msrb.mxu3 %vm643_vm11, %v1688_v29  ;;  %vm3268_vm11 = vcmp.eq.s32.totalorder %v2344_v3, %v1976_v33  ;;  %vm3273_vm0 = vcmp.eq.s32.totalorder %v2398_v5, %v1886_v9 }
 0x1ce   :  { %v2818_v36 = vadd.f32 %v439_v31, %v2781_v14  ;;  %v350_v15 = vadd.f32 %v349_v35, %v306_v13 }
 0x1cf   :  { %v447_v47 = vmax.f32 %v445_v27, %v446_v28  ;;  %1592 = vmatpush.msk.msra.mxu0 %vm3260_vm1, %v1688_v29  ;;  %1640 = vmatpush.msk.msrb.mxu3 %vm641_vm3, %v1688_v29  ;;  %vm3270_vm3 = vcmp.eq.s32.totalorder %v2371_v4, %v1886_v9  ;;  %vm3274_vm1 = vcmp.eq.s32.totalorder %v2398_v5, %v1976_v33 }
 0x1d0   :  { %896 = vmatmul.f32.vlgmr.msrb.gmra.mxu2 %v2818_v36  ;;  %v450_v16 = vsel %vm442_vm2, %v350_v15, -inf }
 0x1d1   :  { %v448_v51 = vrot.slane %v447_v47, 1  ;;  %1621 = vmatpush.msk.msrb.mxu2 %vm615_vm10, %v1688_v29  ;;  %1593 = vmatpush.msk.msra.mxu0 %vm3261_vm14, %v1688_v29  ;;  %v451_v54 = vrot.slane %v450_v16, 4  ;;  %vm3262_vm10 = vcmp.eq.s32.totalorder %v2260_v63, %v1886_v9  ;;  %vm3275_vm14 = vcmp.eq.s32.totalorder %v2056_v43, %v1976_v33 }
 0x1d2   :  { %1641 = vmatpush.msk.msrb.mxu3 %vm639_vm12, %v1688_v29  ;;  %vm3269_vm12 = vcmp.eq.s32.totalorder %v2006_v39, %v1976_v33 }
 0x1d3   :  { %v449_v57 = vmax.f32 %v447_v47, %v448_v51  ;;  %1622 = vmatpush.msk.msrb.mxu2 %vm613_vm13, %v1688_v29  ;;  %1594 = vmatpush.msk.msra.mxu0 %vm3262_vm10, %v1688_v29  ;;  %v452_v18 = vmax.f32 %v450_v16, %v451_v54  ;;  %vm3264_vm13 = vcmp.eq.s32.totalorder %v2317_v2, %v1886_v9 }
 0x1d4   :  { %1642 = vmatpush.msk.msrb.mxu3 %vm637_vm6, %v1688_v29  ;;  %vm3263_vm6 = vcmp.eq.s32.totalorder %v1966_v32, %v1976_v33  ;;  %vm3276_vm10 = vcmp.eq.s32.totalorder %v2419_v6, %v1886_v9 }
 0x1d5   :  { %v464_v24 = vsub.f32 %v330_v19, %v449_v57  ;;  %1623 = vmatpush.msk.msrb.mxu2 %vm611_vm9, %v1688_v29  ;;  %1595 = vmatpush.msk.msra.mxu0 %vm634_vm4, %v1688_v29  ;;  %v453_v21 = vrot.slane %v452_v18, 2  ;;  %v369_v60 = vpop.f32.mrf.mxu2  ;;  %vm3265_vm4 = vcmp.eq.s32.totalorder %v2317_v2, %v1976_v33  ;;  %vm3267_vm9 = vcmp.eq.s32.totalorder %v2344_v3, %v1886_v9 }
 0x1d6   :  { %1643 = vmatpush.msk.msrb.mxu3 %vm635_vm8, %v1688_v29  ;;  %v370_v25 = vadd.f32 %v369_v60, %v306_v13  ;;  %vm3266_vm8 = vcmp.eq.s32.totalorder %v1986_v37, %v1976_v33 }
 0x1d7   :  { %v467_v63 = vmul.f32 1.442695, %v464_v24  ;;  %1624 = vmatpush.msk.msrb.mxu2 %vm3263_vm6, %v1688_v29  ;;  %1596 = vmatpush.msk.msra.mxu0 %vm3264_vm13, %v1688_v29  ;;  %v454_v23 = vmax.f32 %v452_v18, %v453_v21  ;;  %vm3277_vm6 = vcmp.eq.s32.totalorder %v2419_v6, %v1976_v33  ;;  %vm3278_vm13 = vcmp.eq.s32.totalorder %v1908_v17, %v1976_v33 }
 0x1d8   :  { %1644 = vmatpush.msk.msrb.mxu3 %vm3265_vm4, %v1688_v29  ;;  %v457_v1 = vsel %vm442_vm2, %v370_v25, -inf  ;;  %vm3279_vm4 = vcmp.eq.s32.totalorder %v2080_v45, %v1976_v33  ;;  %v1689_v21 = vmov 0.0  }
 0x1d9   :  { %1675 = vpow2.f32 %v467_v63  ;;  %1625 = vmatpush.msk.msrb.mxu2 %vm3266_vm8, %v1688_v29  ;;  %1597 = vmatpush.msk.msra.mxu0 %vm3267_vm9, %v1688_v29  ;;  %v455_v32 = vrot.slane %v454_v23, 1  ;;  %v458_v13 = vrot.slane %v457_v1, 4  ;;  %vm3280_vm8 = vcmp.eq.s32.totalorder %v2436_v7, %v1886_v9 }
 0x1da   :  { %1645 = vmatpush.msk.msrb.mxu3 %vm3268_vm11, %v1688_v29  ;;  %vm3281_vm9 = vcmp.eq.s32.totalorder %v2436_v7, %v1976_v33  ;;  %vm3282_vm11 = vcmp.eq.s32.totalorder %v1915_v20, %v1976_v33 }
 0x1db   :  { %1626 = vmatpush.msk.msrb.mxu2 %vm3269_vm12, %v1688_v29  ;;  %1598 = vmatpush.msk.msra.mxu0 %vm3270_vm3, %v1688_v29  ;;  %v456_v37 = vmax.f32 %v454_v23, %v455_v32  ;;  %v459_v2 = vmax.f32 %v457_v1, %v458_v13  ;;  %vm3283_vm12 = vcmp.eq.s32.totalorder %v2109_v48, %v1976_v33 }
 0x1dc   :  { %1646 = vmatpush.msk.msrb.mxu3 %vm3271_vm5, %v1688_v29  ;;  %vm3284_vm3 = vcmp.eq.s32.totalorder %v2445_v10, %v1886_v9  ;;  %vm3285_vm5 = vcmp.eq.s32.totalorder %v2445_v10, %v1976_v33 }
 0x1dd   :  { %1627 = vmatpush.msk.msrb.mxu2 %vm3272_vm7, %v1688_v29  ;;  %1599 = vmatpush.msk.msra.mxu0 %vm3273_vm0, %v1688_v29  ;;  %v465_v39 = vsub.f32 %v350_v15, %v456_v37  ;;  %v460_v3 = vrot.slane %v459_v2, 2  ;;  %v419_v19 = vpop.f32.mrf.mxu2  ;;  %vm3286_vm7 = vcmp.eq.s32.totalorder %v1925_v22, %v1976_v33  ;;  %vm3287_vm0 = vcmp.eq.s32.totalorder %v2133_v50, %v1976_v33 }
 0x1de   :  { %1647 = vmatpush.msk.msrb.mxu3 %vm3274_vm1, %v1688_v29  ;;  %v420_v26 = vadd.f32 %v419_v19, %v2781_v14  ;;  %vm3288_vm1 = vcmp.eq.s32.totalorder %v2454_v11, %v1886_v9  ;;  %v1105_v19 = vld [vmem:[%s3136_s3] sm:$0x3] }
 0x1df   :  { %v1676_v4 = vpop.eup %1675  ;;  %1628 = vmatpush.msk.msrb.mxu2 %vm3275_vm14, %v1688_v29  ;;  %1600 = vmatpush.msk.msra.mxu0 %vm3276_vm10, %v1688_v29  ;;  %v469_v27 = vmul.f32 1.442695, %v465_v39  ;;  %v461_v28 = vmax.f32 %v459_v2, %v460_v3  ;;  %vm3289_vm14 = vcmp.eq.s32.totalorder %v1956_v30, %v1976_v33  ;;  %vm3290_vm10 = vcmp.eq.s32.totalorder %v2162_v53, %v1976_v33 }
 0x1e0   :  { %v473_v41 = vsel %vm442_vm2, %v1676_v4, 0.0  ;;  %1648 = vmatpush.msk.msrb.mxu3 %vm3277_vm6, %v1688_v29  ;;  %876 = vmatmul.f32.vlgmr.msra.gmra.mxu1 %v420_v26  ;;  %vm3292_vm6 = vcmp.eq.s32.totalorder %v1979_v34, %v1976_v33 }
 0x1e1   :  { %v474_v5 = vrot.slane %v473_v41, 4  ;;  %936 = vmatmul.f32.vlgmr.msrb.gmra.mxu0 %v420_v26  ;;  %1677 = vpow2.f32 %v469_v27  ;;  %v462_v43 = vrot.slane %v461_v28, 1  ;;  %1605 = vmatpush.msk.msra.mxu1 %vm3278_vm13, %v1688_v29  ;;  %vm3293_vm13 = vcmp.eq.s32.totalorder %v2191_v56, %v1976_v33 }
 0x1e2   :  { %1629 = vmatpush.msk.msrb.mxu2 %vm3279_vm4, %v1688_v29  ;;  %1601 = vmatpush.msk.msra.mxu0 %vm3280_vm8, %v1688_v29  ;;  %vm3294_vm4 = vcmp.eq.s32.totalorder %v2463_v12, %v1976_v33  ;;  %vm3295_vm8 = vcmp.eq.s32.totalorder %v1999_v38, %v1976_v33  ;;  %v1115_v27 = vsub.f32 1.0, %v1105_v19 }
 0x1e3   :  { %v475_v14 = vadd.f32 %v474_v5, %v473_v41  ;;  %1649 = vmatpush.msk.msrb.mxu3 %vm3281_vm9, %v1688_v29  ;;  %v463_v6 = vmax.f32 %v461_v28, %v462_v43  ;;  %1606 = vmatpush.msk.msra.mxu1 %vm3282_vm11, %v1688_v29  ;;  %vm3296_vm9 = vcmp.eq.s32.totalorder %v2224_v59, %v1976_v33 }
 0x1e4   :  { %1630 = vmatpush.msk.msrb.mxu2 %vm3283_vm12, %v1688_v29  ;;  %1602 = vmatpush.msk.msra.mxu0 %vm3284_vm3, %v1688_v29  ;;  %vm3297_vm11 = vcmp.eq.s32.totalorder %v2023_v40, %v1976_v33  ;;  %vm3298_vm12 = vcmp.eq.s32.totalorder %v2255_v62, %v1976_v33  ;;  %vm3299_vm3 = vcmp.eq.s32.totalorder %v2047_v42, %v1976_v33 }
 0x1e5   :  { %v476_v17 = vrot.slane %v475_v14, 2  ;;  %1650 = vmatpush.msk.msrb.mxu3 %vm3285_vm5, %v1688_v29  ;;  %v466_v45 = vsub.f32 %v370_v25, %v463_v6  ;;  %1607 = vmatpush.msk.msra.mxu1 %vm3286_vm7, %v1688_v29  ;;  %vm3300_vm5 = vcmp.eq.s32.totalorder %v2285_v0, %v1976_v33  ;;  %vm3301_vm7 = vcmp.eq.s32.totalorder %v2071_v44, %v1976_v33 }
 0x1e6   :  { %1631 = vmatpush.msk.msrb.mxu2 %vm3287_vm0, %v1688_v29  ;;  %1603 = vmatpush.msk.msra.mxu0 %vm3288_vm1, %v1688_v29  ;;  %vm3302_vm0 = vcmp.eq.s32.totalorder %v2091_v46, %v1976_v33  ;;  %vm3303_vm1 = vcmp.eq.s32.totalorder %v2120_v49, %v1976_v33 }
 0x1e7   :  { %v477_v20 = vadd.f32 %v476_v17, %v475_v14  ;;  %1651 = vmatpush.msk.msrb.mxu3 %vm619_vm15, %v1688_v29  ;;  %v1678_v48 = vpop.eup %1677  ;;  %v471_v7 = vmul.f32 1.442695, %v466_v45  ;;  %1608 = vmatpush.msk.msra.mxu1 %vm3289_vm14, %v1688_v29  ;;  %vm3291_vm15 = vcmp.eq.s32.totalorder %v2463_v12, %v1886_v9  ;;  %vm3304_vm14 = vcmp.eq.s32.totalorder %v2159_v52, %v1976_v33  ;;  %v1116_v45 = vld [vmem:[%s3137_s4] sm:$0xff] }
 0x1e8   :  { %1632 = vmatpush.msk.msrb.mxu2 %vm3290_vm10, %v1688_v29  ;;  %v480_v50 = vsel %vm442_vm2, %v1678_v48, 0.0  ;;  %956 = vmatmul.f32.vlgmr.msrb.gmra.mxu1 %v2818_v36  ;;  %vm3305_vm10 = vcmp.eq.s32.totalorder %v2188_v55, %v1976_v33  ;;  %v1119_v17 = vperm.slane %v1115_v27, 0 }
 0x1e9   :  { %v478_v22 = vrot.slane %v477_v20, 1  ;;  %1604 = vmatpush.msk.msra.mxu0 %vm3291_vm15, %v1688_v29  ;;  %v481_v10 = vrot.slane %v480_v50, 4  ;;  %1679 = vpow2.f32 %v471_v7  ;;  %1609 = vmatpush.msk.msra.mxu1 %vm3292_vm6, %v1688_v29  ;;  %vm3306_vm15 = vcmp.eq.s32.totalorder %v2221_v58, %v1976_v33 }
 0x1ea   :  { %1633 = vmatpush.msk.msrb.mxu2 %vm3293_vm13, %v1688_v29  ;;  %1652 = vmatpush.msk.msrb.mxu3 %vm3294_vm4, %v1688_v29  ;;  %vm3307_vm6 = vcmp.eq.s32.totalorder %v2252_v61, %v1976_v33  ;;  %vm3308_vm13 = vcmp.eq.s32.totalorder %v1884_v8, %v1976_v33  ;;  %v1080_v61 = vld [vmem:[%s3135_s2] sm:$0x3] }
 0x1eb   :  { %v479_v30 = vadd.f32 %v478_v22, %v477_v20  ;;  %v482_v9 = vadd.f32 %v481_v10, %v480_v50  ;;  %1610 = vmatpush.msk.msra.mxu1 %vm3295_vm8, %v1688_v29  ;;  %v1081_v54 = vperm.slane %v1080_v61, 0  ;;  %v1082_v18 = vperm.slane %v1080_v61, 1 }
 0x1ec   :  { %1634 = vmatpush.msk.msrb.mxu2 %vm3296_vm9, %v1688_v29  ;;  %v1109_v22 = vperm.slane %v1105_v19, 0 }
 0x1ed   :  { %1681 = vrcp.f32 %v479_v30  ;;  %v483_v34 = vrot.slane %v482_v9, 2  ;;  %1611 = vmatpush.msk.msra.mxu1 %vm3297_vm11, %v1688_v29  ;;  %vm1083_vm4 = vcmp.eq.s32.totalorder %v1884_v8, %v1081_v54  ;;  %vm1084_vm8 = vcmp.eq.s32.totalorder %v1884_v8, %v1082_v18  ;;  %v1198_v18 = vld [vmem:[%s3139_s15 + $0x8] sm:$0xff] }
 0x1ee   :  { %1635 = vmatpush.msk.msrb.mxu2 %vm3298_vm12, %v1688_v29  ;;  %v1653_v60 = vsel %vm1083_vm4, 1.0, %v1689_v21  ;;  %v1654_v39 = vsel %vm1084_vm8, 1.0, %v1689_v21  ;;  %v1123_v30 = vmul.f32 %v1119_v17, %v1116_v45 }
 0x1ef   :  { %v1680_v53 = vpop.eup %1679  ;;  %v484_v38 = vadd.f32 %v483_v34, %v482_v9  ;;  %1612 = vmatpush.msk.msra.mxu1 %vm3299_vm3, %v1688_v29  ;;  %vm3313_vm3 = vcmask 130048  }
 0x1f0   :  { %1636 = vmatpush.msk.msrb.mxu2 %vm3300_vm5, %v1688_v29  ;;  %v487_v40 = vsel %vm442_vm2, %v1680_v53, 0.0  ;;  %vm3314_vm5 = vmmov %vm3313_vm3 }
 0x1f1   :  { %v485_v56 = vrot.slane %v484_v38, 1  ;;  %v488_v59 = vrot.slane %v487_v40, 4  ;;  %1613 = vmatpush.msk.msra.mxu1 %vm3301_vm7, %v1688_v29  ;;  %vm3315_vm7 = vmmov %vm3313_vm3 }
 0x1f3   :  { %v1682_v62 = vpop.eup %1681  ;;  %v489_v11 = vadd.f32 %v488_v59, %v487_v40  ;;  %1614 = vmatpush.msk.msra.mxu1 %vm3302_vm0, %v1688_v29  ;;  %v486_v12 = vadd.f32 %v485_v56, %v484_v38  ;;  %v1120_v38 = vperm.slane %v1115_v27, 1  ;;  %v1117_v40 = vld [vmem:[%s3137_s4 + $0x8] sm:$0xff]  ;;  %vm3316_vm0 = vmmov %vm3313_vm3 }
 0x1f4   :  { %v497_v42 = vmul.f32 %v1682_v62, %v1676_v4 }
 0x1f5   :  { %v490_v0 = vrot.slane %v489_v11, 2  ;;  %1615 = vmatpush.msk.msra.mxu1 %vm3303_vm1, %v1688_v29  ;;  %1683 = vrcp.f32 %v486_v12  ;;  %vm3317_vm1 = vmmov %vm3316_vm0 }
 0x1f6   :  { %976 = vmatmul.f32.vlgmr.msra.gmra.mxu2 %v497_v42 }
 0x1f7   :  { %v491_v31 = vadd.f32 %v490_v0, %v489_v11  ;;  %1616 = vmatpush.msk.msra.mxu1 %vm3304_vm14, %v1688_v29  ;;  %v1127_v11 = vld [vmem:[%s3138_s13] sm:$0xff]  ;;  %v1124_v0 = vmul.f32 %v1120_v38, %v1117_v40  ;;  %vm3318_vm14 = vmmov %vm3316_vm0 }
 0x1f9   :  { %v492_v44 = vrot.slane %v491_v31, 1  ;;  %1617 = vmatpush.msk.msra.mxu1 %vm3305_vm10, %v1688_v29  ;;  %vm3319_vm10 = vmmov %vm3316_vm0 }
 0x1fb   :  { %v1684_v46 = vpop.eup %1683  ;;  %1618 = vmatpush.msk.msra.mxu1 %vm3306_vm15, %v1688_v29  ;;  %v493_v49 = vadd.f32 %v492_v44, %v491_v31  ;;  %vm3320_vm15 = vmmov %vm3316_vm0 }
 0x1fc   :  { %v498_v35 = vmul.f32 %v1684_v46, %v1678_v48  ;;  %v1128_v46 = vld [vmem:[%s3138_s13 + $0x8] sm:$0xff] }
 0x1fd   :  { %1619 = vmatpush.msk.msra.mxu1 %vm3307_vm6, %v1688_v29  ;;  %1685 = vrcp.f32 %v493_v49 }
 0x1fe   :  { %996 = vmatmul.f32.vlgmr.msra.gmra.mxu3 %v498_v35  ;;  %1056 = vmatmul.f32.vlgmr.msrb.gmra.mxu2 %v498_v35 }
 0x1ff   :  { %1620 = vmatpush.msk.msra.mxu1 %vm3308_vm13, %v1688_v29 }
 0x200   :  { %1036 = vmatmul.f32.vlgmr.msra.gmra.mxu1 %v497_v42  ;;  %v1110_v42 = vperm.slane %v1105_v19, 1 }
 0x203   :  { %v1686_v52 = vpop.eup %1685 }
 0x204   :  { %v499_v55 = vmul.f32 %v1686_v52, %v1680_v53  ;;  %v1134_v52 = vpop.permute.xlu0 %1133 }
 0x206   :  { %1016 = vmatmul.f32.vlgmr.msra.gmra.mxu0 %v499_v55  ;;  %1076 = vmatmul.f32.vlgmr.msrb.gmra.mxu3 %v499_v55  ;;  %v1139_v55 = vpop.permute.xlu2 %1138 }
 0x245   :  { %v857_v58 = vpop.f32.mrf.mxu0 }
 0x24b   :  { %v917_v15 = vpop.f32.mrf.mxu3 }
 0x253   :  { %v897_v36 = vpop.f32.mrf.mxu2 }
 0x25d   :  { %v877_v47 = vpop.f32.mrf.mxu1 }
 0x25e   :  { %v937_v51 = vpop.f32.mrf.mxu0  ;;  %v878_v5 = vadd.f32 %v877_v47, %v857_v58 }
 0x25f   :  { %v938_v9 = vadd.f32 %v937_v51, %v917_v15  ;;  %v1197_v51 = vld [vmem:[%s3139_s15] sm:$0xff] }
 0x260   :  { %v898_v20 = vadd.f32 %v897_v36, %v878_v5 }
 0x265   :  { %v957_v57 = vpop.f32.mrf.mxu1 }
 0x266   :  { %v958_v56 = vadd.f32 %v957_v57, %v938_v9 }
 0x279   :  { %v977_v16 = vpop.f32.mrf.mxu2 }
 0x27d   :  { %v1037_v1 = vpop.f32.mrf.mxu1 }
 0x281   :  { %v997_v29 = vpop.f32.mrf.mxu3  ;;  %v1057_v25 = vpop.f32.mrf.mxu2 }
 0x282   :  { %v998_v33 = vadd.f32 %v997_v29, %v977_v16  ;;  %v1058_v32 = vadd.f32 %v1057_v25, %v1037_v1 }
 0x283   :  { %v1017_v24 = vpop.f32.mrf.mxu0 }
 0x284   :  { %v1018_v63 = vadd.f32 %v1017_v24, %v998_v33 }
 0x286   :  { %v1089_v23 = vmul.f32 %v1653_v60, %v1018_v63  ;;  %v1209_v60 = vpop.permute.xlu1 %1208  ;;  %v1204_v63 = vpop.permute.xlu2 %1203 }
 0x288   :  { %v1091_v13 = vsel %vm442_vm2, %v1089_v23, 0.0 }
 0x289   :  { %v1092_v37 = vrot.slane %v1091_v13, 4  ;;  %v1077_v2 = vpop.f32.mrf.mxu3 }
 0x28a   :  { %v1078_v3 = vadd.f32 %v1077_v2, %v1058_v32 }
 0x28b   :  { %v1093_v4 = vadd.f32 %v1092_v37, %v1091_v13  ;;  %v1267_v37 = vld [vmem:[%s3140_s17] sm:$0xff] }
 0x28c   :  { %v1090_v26 = vmul.f32 %v1654_v39, %v1078_v3 }
 0x28d   :  { %v1094_v41 = vrot.slane %v1093_v4, 2 }
 0x28e   :  { %v1098_v28 = vsel %vm442_vm2, %v1090_v26, 0.0  ;;  %vm3309_vm2 = vcmask 64512   ;;  %v1268_v26 = vld [vmem:[%s3140_s17 + $0x8] sm:$0xff] }
 0x28f   :  { %v1095_v8 = vadd.f32 %v1094_v41, %v1093_v4  ;;  %v1099_v43 = vrot.slane %v1098_v28, 4  ;;  %vm3310_vm9 = vmmov %vm3309_vm2  ;;  %v1274_v41 = vpop.permute.xlu0 %1273 }
 0x290   :  { %vm3311_vm11 = vmmov %vm3309_vm2 }
 0x291   :  { %v1096_v14 = vrot.slane %v1095_v8, 1  ;;  %v1100_v6 = vadd.f32 %v1099_v43, %v1098_v28  ;;  %vm3312_vm12 = vmmov %vm3309_vm2  ;;  %v1279_v43 = vpop.permute.xlu1 %1278 }
 0x293   :  { %v1097_v48 = vadd.f32 %v1096_v14, %v1095_v8  ;;  %v1101_v7 = vrot.slane %v1100_v6, 2 }
 0x295   :  { %v1102_v50 = vadd.f32 %v1101_v7, %v1100_v6  ;;  %v1106_v10 = vmul.f32 %v1097_v48, %v898_v20 }
 0x297   :  { %v1103_v34 = vrot.slane %v1102_v50, 1  ;;  %v1113_v53 = vmul.f32 %v1109_v22, %v1106_v10 }
 0x299   :  { %v1104_v59 = vadd.f32 %v1103_v34, %v1102_v50  ;;  %v1125_v62 = vadd.f32 %v1123_v30, %v1113_v53 }
 0x29b   :  { %1162 = vmatpush.msrb.mxu0 %v1125_v62  ;;  %v1107_v12 = vmul.f32 %v1104_v59, %v958_v56 }
 0x29c   :  { %1655 = vmatmul.msk.f32.vlgmr.msrb.gmra.mxu0 %vm3309_vm2, %v1127_v11 }
 0x29d   :  { %v1114_v31 = vmul.f32 %v1110_v42, %v1107_v12 }
 0x29f   :  { %v1126_v44 = vadd.f32 %v1124_v0, %v1114_v31 }
 0x2a1   :  { %1185 = vmatpush.msrb.mxu1 %v1126_v44 }
 0x2a2   :  { %1657 = vmatmul.msk.f32.vlgmr.msrb.gmra.mxu1 %vm3310_vm9, %v1127_v11 }
 0x2a4   :  { %1656 = vmatmul.msk.f32.gmra.mxu0 %vm3311_vm11, %v1128_v46 }
 0x2aa   :  { %1658 = vmatmul.msk.f32.gmra.mxu1 %vm3312_vm12, %v1128_v46 }
 0x319   :  { %v1164_v49 = vpop.f32.mrf.mxu0 }
 0x31a   :  { %v1165_v36 = vadd.f32 %v1164_v49, %v1134_v52 }
 0x31c   :  { %v1193_v61 = vmax.f32 %v1165_v36, 0.0 }
 0x31f   :  { %v1187_v35 = vpop.f32.mrf.mxu1 }
 0x320   :  { %v1188_v54 = vadd.f32 %v1187_v35, %v1134_v52 }
 0x321   :  { %v1167_v58 = vpop.f32.mrf.mxu0 }
 0x322   :  { %v1168_v47 = vadd.f32 %v1167_v58, %v1139_v55  ;;  %v1194_v33 = vmax.f32 %v1188_v54, 0.0 }
 0x324   :  { %v1195_v15 = vmax.f32 %v1168_v47, 0.0 }
 0x326   :  { %1231 = vmatpush.msra.mxu0 %v1195_v15 }
 0x327   :  { %v1190_v16 = vpop.f32.mrf.mxu1 }
 0x328   :  { %v1191_v57 = vadd.f32 %v1190_v16, %v1139_v55  ;;  %1232 = vmatpush.msra.mxu0 %v1193_v61 }
 0x329   :  { %1659 = vmatmul.msk.f32.vlgmr.msra.gmra.mxu0 %vm3313_vm3, %v1197_v51 }
 0x32a   :  { %v1196_v29 = vmax.f32 %v1191_v57, 0.0 }
 0x32c   :  { %1254 = vmatpush.msra.mxu1 %v1196_v29 }
 0x32e   :  { %1255 = vmatpush.msra.mxu1 %v1194_v33 }
 0x32f   :  { %1661 = vmatmul.msk.f32.vlgmr.msra.gmra.mxu1 %vm3314_vm5, %v1197_v51 }
 0x331   :  { %1660 = vmatmul.msk.f32.gmra.mxu0 %vm3315_vm7, %v1198_v18 }
 0x337   :  { %1662 = vmatmul.msk.f32.gmra.mxu1 %vm3316_vm0, %v1198_v18 }
 0x3a6   :  { %v1234_v24 = vpop.f32.mrf.mxu0 }
 0x3a7   :  { %v1235_v23 = vadd.f32 %v1234_v24, %v1204_v63 }
 0x3a9   :  { %v1263_v13 = vmax.f32 %v1235_v23, 0.0 }
 0x3ac   :  { %v1257_v21 = vpop.f32.mrf.mxu1 }
 0x3ad   :  { %v1258_v39 = vadd.f32 %v1257_v21, %v1204_v63 }
 0x3ae   :  { %v1237_v25 = vpop.f32.mrf.mxu0 }
 0x3af   :  { %v1238_v1 = vadd.f32 %v1237_v25, %v1209_v60  ;;  %v1264_v4 = vmax.f32 %v1258_v39, 0.0 }
 0x3b1   :  { %v1265_v32 = vmax.f32 %v1238_v1, 0.0 }
 0x3b3   :  { %1301 = vmatpush.msra.mxu2 %v1265_v32 }
 0x3b4   :  { %v1260_v2 = vpop.f32.mrf.mxu1 }
 0x3b5   :  { %v1261_v3 = vadd.f32 %v1260_v2, %v1209_v60  ;;  %1302 = vmatpush.msra.mxu2 %v1263_v13 }
 0x3b6   :  { %1663 = vmatmul.msk.f32.vlgmr.msra.gmra.mxu2 %vm3317_vm1, %v1267_v37 }
 0x3b7   :  { %v1266_v19 = vmax.f32 %v1261_v3, 0.0 }
 0x3b9   :  { %1324 = vmatpush.msrb.mxu0 %v1266_v19  ;;  %1667 = vmatpush.msra.mxu3 %v1266_v19 }
 0x3bb   :  { %1325 = vmatpush.msrb.mxu0 %v1264_v4  ;;  %1668 = vmatpush.msra.mxu3 %v1264_v4 }
 0x3bc   :  { %1665 = vmatmul.msk.f32.vlgmr.msrb.gmra.mxu0 %vm3318_vm14, %v1267_v37  ;;  %1666 = vmatmul.msk.f32.vlgmr.msra.gmra.mxu3 %vm3319_vm10, %v1268_v26 }
 0x3be   :  { %1664 = vmatmul.msk.f32.gmra.mxu2 %vm3320_vm15, %v1268_v26 }
 0x439   :  { %v1304_v27 = vpop.f32.mrf.mxu2  ;;  %v1327_v28 = vpop.f32.mrf.mxu0 }
 0x43a   :  { %v1305_v5 = vadd.f32 %v1304_v27, %v1274_v41  ;;  %v1328_v8 = vadd.f32 %v1327_v28, %v1274_v41 }
 0x43c   :  { %1333 = vst [vmem:[%s3141_s19] sm:$0xff] %v1305_v5 }
 0x43d   :  { %1334 = vst [vmem:[%s3141_s19 + $0x8] sm:$0xff] %v1328_v8 }
 0x43f   :  { %v1330_v14 = vpop.f32.mrf.mxu3 }
 0x440   :  { %v1331_v6 = vadd.f32 %v1330_v14, %v1279_v43 }
 0x441   :  { %v1307_v17 = vpop.f32.mrf.mxu2 }
 0x442   :  { %1336 = vst [vmem:[%s3141_s19 + $0x18] sm:$0xff] %v1331_v6  ;;  %v1308_v45 = vadd.f32 %v1307_v17, %v1279_v43 }
 0x444   :  { %1335 = vst [vmem:[%s3141_s19 + $0x10] sm:$0xff] %v1308_v45 }

</bundles_post_ra>
